<compile_context>
chip_gen: v7x
topology: tpu7x:2x2x1
jax: 0.10.0
libtpu: 0.0.40
codegen_flags: <defaults>
</compile_context>

<pallas_src>
import functools

import jax
import jax.numpy as jnp
import numpy as np
from jax.experimental import pallas as pl
from jax.experimental.pallas import tpu as pltpu


def _ffn_kernel(x_ref, w_in_ref, b_in_ref, w_dw_ref, b_dw_ref, mask_ref,
                w_out_ref, b_out_ref, o_ref, *, hidden, width):
    nb = x_ref.shape[1]                       # batch_block * h * w  (lane axis)

    x = x_ref[...]                            # (dim, nb)

    # ---- project_in: 1x1 conv == (2H, dim) @ (dim, nb) ---------------------
    y = jnp.dot(w_in_ref[...], x, preferred_element_type=jnp.float32)
    y = y + b_in_ref[...]                     # (2H, nb), bias broadcast over lanes

    # ---- depthwise 3x3 conv (padding=1) via lane rolls + factored masks ----
    # padding masks (1, nb): valid-source predicates for the shifted taps
    col_lo = mask_ref[0]                      # col >= 1     (dj == 0)
    col_hi = mask_ref[1]                      # col <= w-2   (dj == 2)
    row_lo = mask_ref[2]                      # row >= 1     (di == 0)
    row_hi = mask_ref[3]                      # row <= h-2   (di == 2)

    # column-shifted, column-masked copies: yc[dj][q] = y[q + (dj-1)] (0 if OOB col)
    yc = (
        pltpu.roll(y, shift=1, axis=1) * col_lo,        # dj = 0  (source col-1)
        y,                                              # dj = 1
        pltpu.roll(y, shift=nb - 1, axis=1) * col_hi,   # dj = 2  (source col+1)
    )

    def row_shift(a, di):
        off = (di - 1) * width                # flat offset of row di-1
        if off == 0:
            return a
        return pltpu.roll(a, shift=(-off) % nb, axis=1)

    acc = None
    for di in range(3):
        s = (row_shift(yc[0], di) * w_dw_ref[3 * di + 0]
             + row_shift(yc[1], di) * w_dw_ref[3 * di + 1]
             + row_shift(yc[2], di) * w_dw_ref[3 * di + 2])
        if di == 0:
            s = s * row_lo                    # row mask shared by the 3 taps of di
        elif di == 2:
            s = s * row_hi
        acc = s if acc is None else acc + s
    z = acc + b_dw_ref[...]                   # (2H, nb)

    # ---- gated GELU ---------------------------------------------------------
    x1 = z[:hidden, :]
    x2 = z[hidden:, :]
    # TODO(synk): PyTorch F.gelu default is the exact erf form; the tanh
    # approximation is used here (erf has no guaranteed Mosaic lowering);
    # max abs deviation ~1e-3, well inside the test tolerance.
    c0 = 0.7978845608028654                   # sqrt(2/pi)
    c1 = c0 * 0.044715
    t = jnp.tanh(x1 * (c0 + c1 * (x1 * x1)))  # tanh -> EUP (free slot)
    half_x1x2 = 0.5 * (x1 * x2)
    gated = half_x1x2 + half_x1x2 * t         # == gelu_tanh(x1) * x2,  (H, nb)

    # ---- project_out: 1x1 conv == (dim, H) @ (H, nb) ------------------------
    out = jnp.dot(w_out_ref[...], gated, preferred_element_type=jnp.float32)
    o_ref[...] = out + b_out_ref[...]         # lane-dense (dim, nb) store


def feedforward_pallas(x_nchw, params, *, batch_block=1):
    b, c, h, w = x_nchw.shape
    hw = h * w
    hidden = params['w_out'].shape[1]
    two_h = 2 * hidden
    assert b % batch_block == 0, "batch must be divisible by batch_block"
    nb = batch_block * hw
    # (8,128) rule: block's last dim must be 128-divisible or equal the full dim.
    assert nb % 128 == 0 or batch_block == b, "pick batch_block so nb % 128 == 0"

    # NCHW -> lane-dense (channels-in-sublanes, spatial-in-lanes) layout:
    # (b, c, h, w) -> (c, b*h*w); batch elements concatenated along lanes.
    x_flat = jnp.transpose(x_nchw.astype(jnp.float32).reshape(b, c, hw),
                           (1, 0, 2)).reshape(c, b * hw)

    # depthwise weights: (2H, 3, 3) -> (9, 2H, 1); tap index = 3*di + dj
    w_dw = jnp.transpose(params['w_dw'].astype(jnp.float32), (1, 2, 0))
    w_dw = w_dw.reshape(9, two_h)[:, :, None]

    # Factored zero-padding masks (input-independent glue):
    #   [0] col>=1, [1] col<=w-2, [2] row>=1, [3] row<=h-2
    pos = jnp.arange(hw)
    row = pos // w
    col = pos % w
    dw_mask = jnp.stack([
        (col >= 1).astype(jnp.float32),
        (col <= w - 2).astype(jnp.float32),
        (row >= 1).astype(jnp.float32),
        (row <= h - 2).astype(jnp.float32),
    ], axis=0)                                                    # (4, hw)
    dw_mask = jnp.tile(dw_mask, (1, batch_block))[:, None, :]     # (4, 1, nb)

    b_in = params['b_in'].astype(jnp.float32)[:, None]            # (2H, 1)
    b_dw = params['b_dw'].astype(jnp.float32)[:, None]            # (2H, 1)
    b_out = params['b_out'].astype(jnp.float32)[:, None]          # (c, 1)

    kernel = functools.partial(_ffn_kernel, hidden=hidden, width=w)

    out_flat = pl.pallas_call(
        kernel,
        out_shape=jax.ShapeDtypeStruct((c, b * hw), jnp.float32),
        grid_spec=pltpu.PrefetchScalarGridSpec(
            num_scalar_prefetch=0,
            grid=(b // batch_block,),
            in_specs=[
                pl.BlockSpec((c, nb), lambda i: (0, i)),            # x
                pl.BlockSpec((two_h, c), lambda i: (0, 0)),         # w_in
                pl.BlockSpec((two_h, 1), lambda i: (0, 0)),         # b_in
                pl.BlockSpec((9, two_h, 1), lambda i: (0, 0, 0)),   # w_dw taps
                pl.BlockSpec((two_h, 1), lambda i: (0, 0)),         # b_dw
                pl.BlockSpec((4, 1, nb), lambda i: (0, 0, 0)),      # padding masks
                pl.BlockSpec((c, hidden), lambda i: (0, 0)),        # w_out
                pl.BlockSpec((c, 1), lambda i: (0, 0)),             # b_out
            ],
            out_specs=pl.BlockSpec((c, nb), lambda i: (0, i)),
        ),
        compiler_params=pltpu.CompilerParams(
            dimension_semantics=("parallel",)),   # batch axis -> both TCs on v7x
    )(x_flat, params['w_in'].astype(jnp.float32), b_in, w_dw, b_dw, dw_mask,
      params['w_out'].astype(jnp.float32), b_out)

    # (c, b*hw) -> NCHW
    return jnp.transpose(out_flat.reshape(c, b, hw), (1, 0, 2)).reshape(b, c, h, w)


def feedforward_ref(x, params):
    """Plain-JAX reference (NCHW), mirrors the PyTorch forward (exact erf GELU)."""
    b, c, h, w = x.shape
    hidden = params['w_out'].shape[1]
    hp = jax.lax.Precision.HIGHEST

    y = jnp.einsum('oc,bchw->bohw', params['w_in'], x, precision=hp)
    y = y + params['b_in'][None, :, None, None]

    yp = jnp.pad(y, ((0, 0), (0, 0), (1, 1), (1, 1)))
    acc = jnp.zeros_like(y)
    for di in range(3):
        for dj in range(3):
            acc = acc + yp[:, :, di:di + h, dj:dj + w] * \
                params['w_dw'][None, :, di, dj, None, None]
    z = acc + params['b_dw'][None, :, None, None]

    x1 = z[:, :hidden]
    x2 = z[:, hidden:]
    g = jax.nn.gelu(x1, approximate=False) * x2

    out = jnp.einsum('oc,bchw->bohw', params['w_out'], g, precision=hp)
    return out + params['b_out'][None, :, None, None]


if __name__ == "__main__":
    # small shapes consistent with FeedForward(dim=16, ffn_expansion_factor=2.0, bias=True)
    batch, dim = 2, 16
    ffn_expansion_factor = 2.0
    hidden = int(dim * ffn_expansion_factor)      # 32
    h = w = 16

    key = jax.random.PRNGKey(0)
    ks = jax.random.split(key, 7)

    # PyTorch layouts folded into kernel layouts:
    #   w_in[o, c]        == Conv2d(dim, 2*hidden, 1).weight[:, :, 0, 0]
    #   w_dw[ch, ki, kj]  == Conv2d(2*hidden, 2*hidden, 3, groups=2*hidden).weight[ch, 0]
    #   w_out[o, c]       == Conv2d(hidden, dim, 1).weight[:, :, 0, 0]
    params = {
        'w_in':  0.2 * jax.random.normal(ks[0], (2 * hidden, dim), jnp.float32),
        'b_in':  0.1 * jax.random.normal(ks[1], (2 * hidden,), jnp.float32),
        'w_dw':  0.2 * jax.random.normal(ks[2], (2 * hidden, 3, 3), jnp.float32),
        'b_dw':  0.1 * jax.random.normal(ks[3], (2 * hidden,), jnp.float32),
        'w_out': 0.2 * jax.random.normal(ks[4], (dim, hidden), jnp.float32),
        'b_out': 0.1 * jax.random.normal(ks[5], (dim,), jnp.float32),
    }

    x = jax.random.normal(ks[6], (batch, dim, h, w), jnp.float32)   # NCHW like PyTorch

    out = jax.block_until_ready(feedforward_pallas(x, params, batch_block=1))
    ref = jax.block_until_ready(feedforward_ref(x, params))
    np.testing.assert_allclose(np.asarray(out), np.asarray(ref), rtol=2e-2, atol=2e-2)

    print("KERNEL_OK")
</pallas_src>

<mosaic_0001>
module attributes {stable_mosaic.version = 11 : i64} {
  func.func @_ffn_kernel(%arg0: i32, %arg1: memref<16x256xf32, #tpu.memory_space<vmem>>, %arg2: memref<64x16xf32, #tpu.memory_space<vmem>>, %arg3: memref<64x1xf32, #tpu.memory_space<vmem>>, %arg4: memref<9x64x1xf32, #tpu.memory_space<vmem>>, %arg5: memref<64x1xf32, #tpu.memory_space<vmem>>, %arg6: memref<4x1x256xf32, #tpu.memory_space<vmem>>, %arg7: memref<16x32xf32, #tpu.memory_space<vmem>>, %arg8: memref<16x1xf32, #tpu.memory_space<vmem>>, %arg9: memref<16x256xf32, #tpu.memory_space<vmem>>) attributes {dimension_semantics = [#tpu.dimension_semantics<parallel>], iteration_bounds = array<i64: 2>, scalar_prefetch = 0 : i64, scratch_operands = 0 : i64, tpu.core_type = #tpu.core_type<tc>, window_params = [{transform_indices = @transform_0, window_bounds = array<i64: 16, 256>}, {pipeline_mode = #tpu.pipeline_mode<synchronous>, transform_indices = @transform_1, window_bounds = array<i64: 64, 16>}, {pipeline_mode = #tpu.pipeline_mode<synchronous>, transform_indices = @transform_2, window_bounds = array<i64: 64, 1>}, {pipeline_mode = #tpu.pipeline_mode<synchronous>, transform_indices = @transform_3, window_bounds = array<i64: 9, 64, 1>}, {pipeline_mode = #tpu.pipeline_mode<synchronous>, transform_indices = @transform_4, window_bounds = array<i64: 64, 1>}, {pipeline_mode = #tpu.pipeline_mode<synchronous>, transform_indices = @transform_5, window_bounds = array<i64: 4, 1, 256>}, {pipeline_mode = #tpu.pipeline_mode<synchronous>, transform_indices = @transform_6, window_bounds = array<i64: 16, 32>}, {pipeline_mode = #tpu.pipeline_mode<synchronous>, transform_indices = @transform_7, window_bounds = array<i64: 16, 1>}, {transform_indices = @transform_8, window_bounds = array<i64: 16, 256>}]} {
    %c0 = arith.constant 0 : index
    %c0_0 = arith.constant 0 : index
    %0 = vector.load %arg1[%c0, %c0_0] : memref<16x256xf32, #tpu.memory_space<vmem>>, vector<16x256xf32>
    %c0_1 = arith.constant 0 : index
    %c0_2 = arith.constant 0 : index
    %1 = vector.load %arg2[%c0_1, %c0_2] : memref<64x16xf32, #tpu.memory_space<vmem>>, vector<64x16xf32>
    %cst = arith.constant dense<0.000000e+00> : vector<64x256xf32>
    %2 = tpu.matmul %1, %0, %cst {dimension_numbers = #tpu.dot_dimension_numbers<[1], [0], [0], [1], [0, 0, 1, 1], [], []>} : vector<64x16xf32>, vector<16x256xf32>, vector<64x256xf32> -> vector<64x256xf32>
    %c0_3 = arith.constant 0 : index
    %c0_4 = arith.constant 0 : index
    %3 = vector.load %arg3[%c0_3, %c0_4] : memref<64x1xf32, #tpu.memory_space<vmem>>, vector<64x1xf32>
    %4 = vector.broadcast %3 : vector<64x1xf32> to vector<64x256xf32>
    %5 = arith.addf %2, %4 : vector<64x256xf32>
    %c0_5 = arith.constant 0 : index
    %c0_6 = arith.constant 0 : index
    %c0_7 = arith.constant 0 : index
    %6 = vector.load %arg6[%c0_5, %c0_6, %c0_7] : memref<4x1x256xf32, #tpu.memory_space<vmem>>, vector<1x1x256xf32>
    %7 = vector.shape_cast %6 : vector<1x1x256xf32> to vector<1x256xf32>
    %c1 = arith.constant 1 : index
    %c0_8 = arith.constant 0 : index
    %c0_9 = arith.constant 0 : index
    %8 = vector.load %arg6[%c1, %c0_8, %c0_9] : memref<4x1x256xf32, #tpu.memory_space<vmem>>, vector<1x1x256xf32>
    %9 = vector.shape_cast %8 : vector<1x1x256xf32> to vector<1x256xf32>
    %c2 = arith.constant 2 : index
    %c0_10 = arith.constant 0 : index
    %c0_11 = arith.constant 0 : index
    %10 = vector.load %arg6[%c2, %c0_10, %c0_11] : memref<4x1x256xf32, #tpu.memory_space<vmem>>, vector<1x1x256xf32>
    %11 = vector.shape_cast %10 : vector<1x1x256xf32> to vector<1x256xf32>
    %c3 = arith.constant 3 : index
    %c0_12 = arith.constant 0 : index
    %c0_13 = arith.constant 0 : index
    %12 = vector.load %arg6[%c3, %c0_12, %c0_13] : memref<4x1x256xf32, #tpu.memory_space<vmem>>, vector<1x1x256xf32>
    %13 = vector.shape_cast %12 : vector<1x1x256xf32> to vector<1x256xf32>
    %c1_i32 = arith.constant 1 : i32
    %14 = tpu.dynamic_rotate %5 by %c1_i32 dim 1 : vector<64x256xf32>, i32 -> vector<64x256xf32>
    %15 = vector.broadcast %7 : vector<1x256xf32> to vector<64x256xf32>
    %16 = arith.mulf %14, %15 : vector<64x256xf32>
    %c255_i32 = arith.constant 255 : i32
    %17 = tpu.dynamic_rotate %5 by %c255_i32 dim 1 : vector<64x256xf32>, i32 -> vector<64x256xf32>
    %18 = vector.broadcast %9 : vector<1x256xf32> to vector<64x256xf32>
    %19 = arith.mulf %17, %18 : vector<64x256xf32>
    %c16_i32 = arith.constant 16 : i32
    %20 = tpu.dynamic_rotate %16 by %c16_i32 dim 1 : vector<64x256xf32>, i32 -> vector<64x256xf32>
    %c0_14 = arith.constant 0 : index
    %c0_15 = arith.constant 0 : index
    %c0_16 = arith.constant 0 : index
    %21 = vector.load %arg4[%c0_14, %c0_15, %c0_16] : memref<9x64x1xf32, #tpu.memory_space<vmem>>, vector<1x64x1xf32>
    %22 = vector.shape_cast %21 : vector<1x64x1xf32> to vector<64x1xf32>
    %23 = vector.broadcast %22 : vector<64x1xf32> to vector<64x256xf32>
    %24 = arith.mulf %20, %23 : vector<64x256xf32>
    %c16_i32_17 = arith.constant 16 : i32
    %25 = tpu.dynamic_rotate %5 by %c16_i32_17 dim 1 : vector<64x256xf32>, i32 -> vector<64x256xf32>
    %c1_18 = arith.constant 1 : index
    %c0_19 = arith.constant 0 : index
    %c0_20 = arith.constant 0 : index
    %26 = vector.load %arg4[%c1_18, %c0_19, %c0_20] : memref<9x64x1xf32, #tpu.memory_space<vmem>>, vector<1x64x1xf32>
    %27 = vector.shape_cast %26 : vector<1x64x1xf32> to vector<64x1xf32>
    %28 = vector.broadcast %27 : vector<64x1xf32> to vector<64x256xf32>
    %29 = arith.mulf %25, %28 : vector<64x256xf32>
    %30 = arith.addf %24, %29 : vector<64x256xf32>
    %c16_i32_21 = arith.constant 16 : i32
    %31 = tpu.dynamic_rotate %19 by %c16_i32_21 dim 1 : vector<64x256xf32>, i32 -> vector<64x256xf32>
    %c2_22 = arith.constant 2 : index
    %c0_23 = arith.constant 0 : index
    %c0_24 = arith.constant 0 : index
    %32 = vector.load %arg4[%c2_22, %c0_23, %c0_24] : memref<9x64x1xf32, #tpu.memory_space<vmem>>, vector<1x64x1xf32>
    %33 = vector.shape_cast %32 : vector<1x64x1xf32> to vector<64x1xf32>
    %34 = vector.broadcast %33 : vector<64x1xf32> to vector<64x256xf32>
    %35 = arith.mulf %31, %34 : vector<64x256xf32>
    %36 = arith.addf %30, %35 : vector<64x256xf32>
    %37 = vector.broadcast %11 : vector<1x256xf32> to vector<64x256xf32>
    %38 = arith.mulf %36, %37 : vector<64x256xf32>
    %c3_25 = arith.constant 3 : index
    %c0_26 = arith.constant 0 : index
    %c0_27 = arith.constant 0 : index
    %39 = vector.load %arg4[%c3_25, %c0_26, %c0_27] : memref<9x64x1xf32, #tpu.memory_space<vmem>>, vector<1x64x1xf32>
    %40 = vector.shape_cast %39 : vector<1x64x1xf32> to vector<64x1xf32>
    %41 = vector.broadcast %40 : vector<64x1xf32> to vector<64x256xf32>
    %42 = arith.mulf %16, %41 : vector<64x256xf32>
    %c4 = arith.constant 4 : index
    %c0_28 = arith.constant 0 : index
    %c0_29 = arith.constant 0 : index
    %43 = vector.load %arg4[%c4, %c0_28, %c0_29] : memref<9x64x1xf32, #tpu.memory_space<vmem>>, vector<1x64x1xf32>
    %44 = vector.shape_cast %43 : vector<1x64x1xf32> to vector<64x1xf32>
    %45 = vector.broadcast %44 : vector<64x1xf32> to vector<64x256xf32>
    %46 = arith.mulf %5, %45 : vector<64x256xf32>
    %47 = arith.addf %42, %46 : vector<64x256xf32>
    %c5 = arith.constant 5 : index
    %c0_30 = arith.constant 0 : index
    %c0_31 = arith.constant 0 : index
    %48 = vector.load %arg4[%c5, %c0_30, %c0_31] : memref<9x64x1xf32, #tpu.memory_space<vmem>>, vector<1x64x1xf32>
    %49 = vector.shape_cast %48 : vector<1x64x1xf32> to vector<64x1xf32>
    %50 = vector.broadcast %49 : vector<64x1xf32> to vector<64x256xf32>
    %51 = arith.mulf %19, %50 : vector<64x256xf32>
    %52 = arith.addf %47, %51 : vector<64x256xf32>
    %53 = arith.addf %38, %52 : vector<64x256xf32>
    %c240_i32 = arith.constant 240 : i32
    %54 = tpu.dynamic_rotate %16 by %c240_i32 dim 1 : vector<64x256xf32>, i32 -> vector<64x256xf32>
    %c6 = arith.constant 6 : index
    %c0_32 = arith.constant 0 : index
    %c0_33 = arith.constant 0 : index
    %55 = vector.load %arg4[%c6, %c0_32, %c0_33] : memref<9x64x1xf32, #tpu.memory_space<vmem>>, vector<1x64x1xf32>
    %56 = vector.shape_cast %55 : vector<1x64x1xf32> to vector<64x1xf32>
    %57 = vector.broadcast %56 : vector<64x1xf32> to vector<64x256xf32>
    %58 = arith.mulf %54, %57 : vector<64x256xf32>
    %c240_i32_34 = arith.constant 240 : i32
    %59 = tpu.dynamic_rotate %5 by %c240_i32_34 dim 1 : vector<64x256xf32>, i32 -> vector<64x256xf32>
    %c7 = arith.constant 7 : index
    %c0_35 = arith.constant 0 : index
    %c0_36 = arith.constant 0 : index
    %60 = vector.load %arg4[%c7, %c0_35, %c0_36] : memref<9x64x1xf32, #tpu.memory_space<vmem>>, vector<1x64x1xf32>
    %61 = vector.shape_cast %60 : vector<1x64x1xf32> to vector<64x1xf32>
    %62 = vector.broadcast %61 : vector<64x1xf32> to vector<64x256xf32>
    %63 = arith.mulf %59, %62 : vector<64x256xf32>
    %64 = arith.addf %58, %63 : vector<64x256xf32>
    %c240_i32_37 = arith.constant 240 : i32
    %65 = tpu.dynamic_rotate %19 by %c240_i32_37 dim 1 : vector<64x256xf32>, i32 -> vector<64x256xf32>
    %c8 = arith.constant 8 : index
    %c0_38 = arith.constant 0 : index
    %c0_39 = arith.constant 0 : index
    %66 = vector.load %arg4[%c8, %c0_38, %c0_39] : memref<9x64x1xf32, #tpu.memory_space<vmem>>, vector<1x64x1xf32>
    %67 = vector.shape_cast %66 : vector<1x64x1xf32> to vector<64x1xf32>
    %68 = vector.broadcast %67 : vector<64x1xf32> to vector<64x256xf32>
    %69 = arith.mulf %65, %68 : vector<64x256xf32>
    %70 = arith.addf %64, %69 : vector<64x256xf32>
    %71 = vector.broadcast %13 : vector<1x256xf32> to vector<64x256xf32>
    %72 = arith.mulf %70, %71 : vector<64x256xf32>
    %73 = arith.addf %53, %72 : vector<64x256xf32>
    %c0_40 = arith.constant 0 : index
    %c0_41 = arith.constant 0 : index
    %74 = vector.load %arg5[%c0_40, %c0_41] : memref<64x1xf32, #tpu.memory_space<vmem>>, vector<64x1xf32>
    %75 = vector.broadcast %74 : vector<64x1xf32> to vector<64x256xf32>
    %76 = arith.addf %73, %75 : vector<64x256xf32>
    %77 = vector.extract_strided_slice %76 {offsets = [0, 0], sizes = [32, 256], strides = [1, 1]} : vector<64x256xf32> to vector<32x256xf32>
    %78 = vector.extract_strided_slice %76 {offsets = [32, 0], sizes = [32, 256], strides = [1, 1]} : vector<64x256xf32> to vector<32x256xf32>
    %79 = arith.mulf %77, %77 : vector<32x256xf32>
    %cst_42 = arith.constant 0.0356774069 : f32
    %80 = vector.broadcast %cst_42 : f32 to vector<32x256xf32>
    %81 = arith.mulf %80, %79 : vector<32x256xf32>
    %cst_43 = arith.constant 0.797884583 : f32
    %82 = vector.broadcast %cst_43 : f32 to vector<32x256xf32>
    %83 = arith.addf %82, %81 : vector<32x256xf32>
    %84 = arith.mulf %77, %83 : vector<32x256xf32>
    %85 = math.tanh %84 : vector<32x256xf32>
    %86 = arith.mulf %77, %78 : vector<32x256xf32>
    %cst_44 = arith.constant 5.000000e-01 : f32
    %87 = vector.broadcast %cst_44 : f32 to vector<32x256xf32>
    %88 = arith.mulf %87, %86 : vector<32x256xf32>
    %89 = arith.mulf %88, %85 : vector<32x256xf32>
    %90 = arith.addf %88, %89 : vector<32x256xf32>
    %c0_45 = arith.constant 0 : index
    %c0_46 = arith.constant 0 : index
    %91 = vector.load %arg7[%c0_45, %c0_46] : memref<16x32xf32, #tpu.memory_space<vmem>>, vector<16x32xf32>
    %cst_47 = arith.constant dense<0.000000e+00> : vector<16x256xf32>
    %92 = tpu.matmul %91, %90, %cst_47 {dimension_numbers = #tpu.dot_dimension_numbers<[1], [0], [0], [1], [0, 0, 1, 1], [], []>} : vector<16x32xf32>, vector<32x256xf32>, vector<16x256xf32> -> vector<16x256xf32>
    %c0_48 = arith.constant 0 : index
    %c0_49 = arith.constant 0 : index
    %93 = vector.load %arg8[%c0_48, %c0_49] : memref<16x1xf32, #tpu.memory_space<vmem>>, vector<16x1xf32>
    %94 = vector.broadcast %93 : vector<16x1xf32> to vector<16x256xf32>
    %95 = arith.addf %92, %94 : vector<16x256xf32>
    %c0_50 = arith.constant 0 : index
    %c0_51 = arith.constant 0 : index
    %96 = vector.load %arg9[%c0_50, %c0_51] : memref<16x256xf32, #tpu.memory_space<vmem>>, vector<16x256xf32>
    tpu.vector_store %arg9[%c0_50, %c0_51], %95 {strides = array<i32>} : memref<16x256xf32, #tpu.memory_space<vmem>>, vector<16x256xf32>,
    return
  }
  func.func @transform_0(%arg0: i32) -> (i32, i32) {
    %c0_i32 = arith.constant 0 : i32
    %c0_i32_0 = arith.constant 0 : i32
    return %c0_i32, %arg0 : i32, i32
  }
  func.func @transform_1(%arg0: i32) -> (i32, i32) {
    %c0_i32 = arith.constant 0 : i32
    %c0_i32_0 = arith.constant 0 : i32
    %c0_i32_1 = arith.constant 0 : i32
    return %c0_i32, %c0_i32_0 : i32, i32
  }
  func.func @transform_2(%arg0: i32) -> (i32, i32) {
    %c0_i32 = arith.constant 0 : i32
    %c0_i32_0 = arith.constant 0 : i32
    %c0_i32_1 = arith.constant 0 : i32
    return %c0_i32, %c0_i32_0 : i32, i32
  }
  func.func @transform_3(%arg0: i32) -> (i32, i32, i32) {
    %c0_i32 = arith.constant 0 : i32
    %c0_i32_0 = arith.constant 0 : i32
    %c0_i32_1 = arith.constant 0 : i32
    %c0_i32_2 = arith.constant 0 : i32
    return %c0_i32, %c0_i32_0, %c0_i32_1 : i32, i32, i32
  }
  func.func @transform_4(%arg0: i32) -> (i32, i32) {
    %c0_i32 = arith.constant 0 : i32
    %c0_i32_0 = arith.constant 0 : i32
    %c0_i32_1 = arith.constant 0 : i32
    return %c0_i32, %c0_i32_0 : i32, i32
  }
  func.func @transform_5(%arg0: i32) -> (i32, i32, i32) {
    %c0_i32 = arith.constant 0 : i32
    %c0_i32_0 = arith.constant 0 : i32
    %c0_i32_1 = arith.constant 0 : i32
    %c0_i32_2 = arith.constant 0 : i32
    return %c0_i32, %c0_i32_0, %c0_i32_1 : i32, i32, i32
  }
  func.func @transform_6(%arg0: i32) -> (i32, i32) {
    %c0_i32 = arith.constant 0 : i32
    %c0_i32_0 = arith.constant 0 : i32
    %c0_i32_1 = arith.constant 0 : i32
    return %c0_i32, %c0_i32_0 : i32, i32
  }
  func.func @transform_7(%arg0: i32) -> (i32, i32) {
    %c0_i32 = arith.constant 0 : i32
    %c0_i32_0 = arith.constant 0 : i32
    %c0_i32_1 = arith.constant 0 : i32
    return %c0_i32, %c0_i32_0 : i32, i32
  }
  func.func @transform_8(%arg0: i32) -> (i32, i32) {
    %c0_i32 = arith.constant 0 : i32
    %c0_i32_0 = arith.constant 0 : i32
    return %c0_i32, %arg0 : i32, i32
  }
}

</mosaic_0001>

<bundles_post_ra>
// kernel: tpu_custom_call.1
= control target key start
LH: loop header
LB: loop body
LE: loop exit
PB: predicated region body
PF: predicated region fallthrough
CT: control target
= control target key end

     0   :  { %13 = vsyncpa [#allocation4], 0  ;;  %s4047_s0 = inlined_call_operand.vmem [shape: f32[16,512], index: 0, kind: input, shape index: {}]   ;;  %s4048_s1 = inlined_call_operand.vmem [shape: f32[64,16], index: 1, kind: input, shape index: {}]   ;;  %s4049_s2 = inlined_call_operand.vmem [shape: f32[64,1], index: 2, kind: input, shape index: {}]   ;;  %s4050_s3 = inlined_call_operand.vmem [shape: f32[9,64,1], index: 3, kind: input, shape index: {}]   ;;  %s4051_s4 = inlined_call_operand.vmem [shape: f32[64,1], index: 4, kind: input, shape index: {}]   ;;  %s4052_s5 = inlined_call_operand.vmem [shape: f32[4,1,256], index: 5, kind: input, shape index: {}]   ;;  %s4053_s6 = inlined_call_operand.vmem [shape: f32[16,32], index: 6, kind: input, shape index: {}]   ;;  %s4054_s7 = inlined_call_operand.vmem [shape: f32[16,1], index: 7, kind: input, shape index: {}]   ;;  %s4055_s8 = inlined_call_operand.hbm [shape: f32[16,512], index: 8, kind: output, shape index: {}]  }
   0x1   :  { %15 = vsyncpa [#allocation4 + $0x1], 0  ;;  %s2357_s27 = smov 0   ;;  %s2359_s28 = smov 0  }
   0x2   :  { %s2361_s29 = smov 0   ;;  %s2363_s30 = smov 0  }
   0x3 LB: > { %s2066_s9 = sadd.s32 4294967295, %s2301_s30   ;;  %s2067_s10 = sadd.s32 4294967294, %s2301_s30   ;;  %s2301_s30 = sphi %s2363_s30, %s4236_s30   ;;  %s2297_s29 = sphi %s2361_s29, %s4235_s29   ;;  %s2293_s28 = sphi %s2359_s28, %s4234_s28   ;;  %s2289_s27 = sphi %s2357_s27, %s4233_s27  }
   0x4   : > { %s2380_s11 = sadd.s32 1, %s2301_s30   ;;  %s28_s12 = sadd.s32 1, %s2297_s29 }
   0x5   : > { %s25_s13 = ssub.s32 %s2301_s30, %s2380_s11  ;;  %p35_p0 = scmp.ne.s32.totalorder %s2297_s29, %s2293_s28 }
   0x6   : > { %p26_p1 = scmp.eq.s32.totalorder %s25_s13, 0  ;;  %p36_p2 = scmp.eq.s32.totalorder %s2301_s30, 0 }
   0x7   : > { %p212_p3 = scmp.eq.s32.totalorder %s2066_s9, 1  ;;  %p217_p4 = scmp.ne.s32.totalorder %s2293_s28, %s2289_s27 }
   0x8   : > { %s2393_s14 = scalar_select %p26_p1, %s2297_s29, %s28_s12  }
   0x9   : > { %p37_p5 = por %p36_p2, %p35_p0  ;;  %p2395_p6 = por %p212_p3, %p35_p0 }
   0xa   : > { %p218_p7 = scmp.eq.s32.totalorder %s2067_s10, 1  ;;  %p2069_p9 = scmp.ge.s32.totalorder %s2301_s30, 2 }
   0xc   : > { %p2399_p8 = por %p218_p7, %p217_p4  ;;  %255 = sbr.rel (%p2069_p9) target bundleno = 26 (0x1a), region = 44 }
  0x13   : > { %258 = sbr.rel (!%p37_p5) target bundleno = 26 (0x1a), region = 48  ;;  %s260_s17 = sand.u32 (%p37_p5), 1, %s2297_s29  }
  0x14   : > { %s2158_s18 = sshll.u32 (%p37_p5), %s2301_s30, 4  ;;  %s2070_s19 = sshll.u32 (%p37_p5), %s260_s17, 5 }
  0x15   : > { %s265_s22 = scalar_lea.vmem (%p37_p5), %s4047_s0, %s2158_s18  ;;  %s262_s23 = scalar_lea.vmem (%p37_p5), [#allocation2], %s2070_s19 }
  0x16   : > { %v278_v0 = vld [vmem:[%s265_s22] sm:$0xff] (%p37_p5)  ;;  %v280_v1 = vld [vmem:[%s265_s22 + $0x8] sm:$0xff] (%p37_p5) }
  0x17   : > { %v282_v2 = vld [vmem:[%s265_s22 + $0x20] sm:$0xff] (%p37_p5)  ;;  %279 = vst [vmem:[%s262_s23] sm:$0xff] (%p37_p5), %v278_v0  ;;  %281 = vst [vmem:[%s262_s23 + $0x8] sm:$0xff] (%p37_p5), %v280_v1  ;;  %v284_v3 = vld [vmem:[%s265_s22 + $0x28] sm:$0xff] (%p37_p5) }
  0x18   : > { %283 = vst [vmem:[%s262_s23 + $0x10] sm:$0xff] (%p37_p5), %v282_v2  ;;  %285 = vst [vmem:[%s262_s23 + $0x18] sm:$0xff] (%p37_p5), %v284_v3 }
  0x1a PF: > { %p2073_p10 = scmp.ge.s32.totalorder %s2301_s30, 1  ;;  %p290_p11 = scmp.lt.s32.totalorder %s2301_s30, 3 }
  0x1c   : > { %p291_p12 = pnand %p2073_p10, %p290_p11 }
  0x1e   : > { %294 = sbr.rel (%p291_p12) target bundleno = 963 (0x3c3), region = 71 }
  0x25   : > { %v346_v4 = vld [vmem:[%s4049_s2 + $0x10] sm:$0xff]  ;;  %v344_v5 = vld [vmem:[%s4049_s2] sm:$0xff]  ;;  %s297_s12 = sand.u32 1, %s2293_s28   ;;  %v2303_v6 = vmov 0   ;;  %v347_v7 = vld [vmem:[%s4049_s2 + $0x18] sm:$0xff]  ;;  %v4056_v12 = vmov 0.0  }
  0x26   : > { %2222 = vset.pattern.permute.xlu1 %v2303_v6  ;;  %2221 = vset.pattern.permute.xlu0 %v2303_v6  ;;  %s2422_s13 = sshll.u32 %s297_s12, 5  ;;  %v345_v8 = vld [vmem:[%s4049_s2 + $0x8] sm:$0xff]  ;;  %v348_v17 = vld [vmem:[%s4049_s2 + $0x20] sm:$0xff]  ;;  %vm392_vm0 = vcmask 130048   ;;  %v351_v20 = vld [vmem:[%s4049_s2 + $0x38] sm:$0xff]  ;;  %s2305_s17 = smov 1  }
  0x27   : > { %364 = vperm.xlu1 %2222, %v346_v4   ;;  %354 = vperm.xlu0 %2221, %v344_v5   ;;  %s299_s21 = scalar_lea.vmem [#allocation2], %s2422_s13  ;;  %v349_v16 = vld [vmem:[%s4049_s2 + $0x28] sm:$0xff]  ;;  %v336_v18 = vld [vmem:[%s4048_s1] sm:$0xff]  ;;  %v350_v21 = vld [vmem:[%s4049_s2 + $0x30] sm:$0xff]  ;;  %s2306_s18 = smov 127   ;;  %vm1897_vm5 = vcmask 261120  }
  0x28   : > { %v333_v9 = vld [vmem:[%s299_s21 + $0x8] sm:$0xff]  ;;  %v335_v10 = vld [vmem:[%s299_s21 + $0x18] sm:$0xff]  ;;  %v332_v11 = vld [vmem:[%s299_s21] sm:$0xff]  ;;  %481 = vmatprep.mubr.f32.mxu0 %v4056_v12  ;;  %511 = vmatprep.mubr.f32.mxu1 %v4056_v12  ;;  %s2307_s19 = smov 16   ;;  %s2308_s20 = smov 112  }
  0x29   : > { %v2160_v13 = vpack.c.bf16 %v335_v10, %v333_v9  ;;  %v334_v14 = vld [vmem:[%s299_s21 + $0x10] sm:$0xff]  ;;  %v341_v19 = vld [vmem:[%s4048_s1 + $0x28] sm:$0xff]  ;;  %v740_v25 = vld [vmem:[%s4050_s3] sm:$0xff]  ;;  %s2159_s21 = sshll.u32 %s2066_s9, 8  ;;  %s4004_s9 = scalar_lea.sflag [#allocation4], %s297_s12 }
  0x2a   : > { %v2162_v15 = vpack.c.bf16 %v334_v14, %v332_v11  ;;  %v337_v22 = vld [vmem:[%s4048_s1 + $0x8] sm:$0xff]  ;;  %v342_v23 = vld [vmem:[%s4048_s1 + $0x30] sm:$0xff]  ;;  %v343_v27 = vld [vmem:[%s4048_s1 + $0x38] sm:$0xff] }
  0x2b   : > { %369 = vperm.xlu1 %2222, %v347_v7   ;;  %359 = vperm.xlu0 %2221, %v345_v8   ;;  %v741_v24 = vld [vmem:[%s4050_s3 + $0x8] sm:$0xff]  ;;  %v338_v26 = vld [vmem:[%s4048_s1 + $0x10] sm:$0xff]  ;;  %v743_v28 = vld [vmem:[%s4050_s3 + $0x18] sm:$0xff] }
  0x2c   : > { %2161 = vmatprep.subr.bf16.mxu0 %v2160_v13  ;;  %2172 = vmatprep.subr.bf16.mxu1 %v2160_v13  ;;  %v742_v29 = vld [vmem:[%s4050_s3 + $0x10] sm:$0xff]  ;;  %v339_v30 = vld [vmem:[%s4048_s1 + $0x18] sm:$0xff]  ;;  %v745_v31 = vld [vmem:[%s4050_s3 + $0x28] sm:$0xff] }
  0x2d   : > { %2163 = vmatpush1.bf16.msra.mxu0 %v2162_v15  ;;  %2173 = vmatpush1.bf16.msra.mxu1 %v2162_v15  ;;  %v744_v32 = vld [vmem:[%s4050_s3 + $0x20] sm:$0xff]  ;;  %v747_v34 = vld [vmem:[%s4050_s3 + $0x38] sm:$0xff]  ;;  %v746_v35 = vld [vmem:[%s4050_s3 + $0x30] sm:$0xff] }
  0x2e   : > { %v340_v33 = vld [vmem:[%s4048_s1 + $0x20] sm:$0xff]  ;;  %v2088_v36 = vld [vmem:[%s4050_s3 + $0x48] sm:$0xff]  ;;  %v2090_v38 = vld [vmem:[%s4050_s3 + $0x58] sm:$0xff] }
  0x2f   : > { %379 = vperm.xlu1 %2222, %v349_v16   ;;  %374 = vperm.xlu0 %2221, %v348_v17   ;;  %v2087_v37 = vld [vmem:[%s4050_s3 + $0x40] sm:$0xff]  ;;  %v2089_v39 = vld [vmem:[%s4050_s3 + $0x50] sm:$0xff]  ;;  %v2092_v40 = vld [vmem:[%s4050_s3 + $0x68] sm:$0xff] }
  0x30   : > { %2076 = vmatmul.mubr.msk.f32.vlgmr.msra.gmra.mrb[0].mxu0 %vm392_vm0, %v336_v18  ;;  %2081 = vmatmul.mubr.msk.f32.vlgmr.msra.gmra.mrb[0].mxu1 %vm392_vm0, %v341_v19  ;;  %v2091_v41 = vld [vmem:[%s4050_s3 + $0x60] sm:$0xff]  ;;  %v2094_v42 = vld [vmem:[%s4050_s3 + $0x78] sm:$0xff]  ;;  %v2093_v43 = vld [vmem:[%s4050_s3 + $0x70] sm:$0xff] }
  0x31   : > { %487 = vmatprep.mubr.f32.mxu0 %v4056_v12  ;;  %517 = vmatprep.mubr.f32.mxu1 %v4056_v12  ;;  %v2096_v44 = vld [vmem:[%s4050_s3 + $0x88] sm:$0xff]  ;;  %v2095_v45 = vld [vmem:[%s4050_s3 + $0x80] sm:$0xff]  ;;  %v2098_v46 = vld [vmem:[%s4050_s3 + $0x98] sm:$0xff] }
  0x32   : > { %v2097_v47 = vld [vmem:[%s4050_s3 + $0x90] sm:$0xff]  ;;  %v2100_v48 = vld [vmem:[%s4050_s3 + $0xa8] sm:$0xff]  ;;  %v2099_v49 = vld [vmem:[%s4050_s3 + $0xa0] sm:$0xff] }
  0x33   : > { %389 = vperm.xlu1 %2222, %v351_v20   ;;  %384 = vperm.xlu0 %2221, %v350_v21   ;;  %v2102_v50 = vld [vmem:[%s4050_s3 + $0xb8] sm:$0xff]  ;;  %v2101_v51 = vld [vmem:[%s4050_s3 + $0xb0] sm:$0xff]  ;;  %v2104_v52 = vld [vmem:[%s4050_s3 + $0xc8] sm:$0xff] }
  0x34   : > { %2077 = vmatmul.mubr.msk.f32.gmra.mrb[2].mxu0 %vm392_vm0, %v337_v22  ;;  %2082 = vmatmul.mubr.msk.f32.gmra.mrb[2].mxu1 %vm392_vm0, %v342_v23  ;;  %v2103_v53 = vld [vmem:[%s4050_s3 + $0xc0] sm:$0xff]  ;;  %v2112_v54 = vld [vmem:[%s4050_s3 + $0x108] sm:$0xff]  ;;  %v2106_v0 = vld [vmem:[%s4050_s3 + $0xd8] sm:$0xff] }
  0x35   : > { %493 = vmatprep.mubr.f32.mxu0 %v4056_v12  ;;  %523 = vmatprep.mubr.f32.mxu1 %v4056_v12  ;;  %v2111_v55 = vld [vmem:[%s4050_s3 + $0x100] sm:$0xff]  ;;  %v2128_v56 = vld [vmem:[%s4050_s3 + $0x188] sm:$0xff]  ;;  %v2105_v1 = vld [vmem:[%s4050_s3 + $0xd0] sm:$0xff] }
  0x36   : > { %v2127_v57 = vld [vmem:[%s4050_s3 + $0x180] sm:$0xff]  ;;  %v2136_v58 = vld [vmem:[%s4050_s3 + $0x1c8] sm:$0xff]  ;;  %v2114_v2 = vld [vmem:[%s4050_s3 + $0x118] sm:$0xff] }
  0x37   : > { %755 = vperm.xlu1 %2222, %v741_v24   ;;  %750 = vperm.xlu0 %2221, %v740_v25   ;;  %v2135_v59 = vld [vmem:[%s4050_s3 + $0x1c0] sm:$0xff]  ;;  %v2120_v60 = vld [vmem:[%s4050_s3 + $0x148] sm:$0xff]  ;;  %v2113_v3 = vld [vmem:[%s4050_s3 + $0x110] sm:$0xff] }
  0x38   : > { %2078 = vmatmul.mubr.msk.f32.gmra.mrb[4].mxu0 %vm392_vm0, %v338_v26  ;;  %2083 = vmatmul.mubr.msk.f32.gmra.mrb[4].mxu1 %vm392_vm0, %v343_v27  ;;  %v2119_v61 = vld [vmem:[%s4050_s3 + $0x140] sm:$0xff]  ;;  %v2144_v62 = vld [vmem:[%s4050_s3 + $0x208] sm:$0xff]  ;;  %v2130_v4 = vld [vmem:[%s4050_s3 + $0x198] sm:$0xff] }
  0x39   : > { %499 = vmatprep.mubr.f32.mxu0 %v4056_v12  ;;  %1968 = vmatprep.mubr.f32.mxu1 %v4056_v12  ;;  %v2143_v63 = vld [vmem:[%s4050_s3 + $0x200] sm:$0xff]  ;;  %v2129_v5 = vld [vmem:[%s4050_s3 + $0x190] sm:$0xff]  ;;  %v2138_v6 = vld [vmem:[%s4050_s3 + $0x1d8] sm:$0xff] }
  0x3a   : > { %v2137_v7 = vld [vmem:[%s4050_s3 + $0x1d0] sm:$0xff]  ;;  %v2122_v8 = vld [vmem:[%s4050_s3 + $0x158] sm:$0xff]  ;;  %v1748_v13 = vld [vmem:[%s4051_s4 + $0x8] sm:$0xff] }
  0x3b   : > { %765 = vperm.xlu1 %2222, %v743_v28   ;;  %760 = vperm.xlu0 %2221, %v742_v29   ;;  %v2121_v9 = vld [vmem:[%s4050_s3 + $0x150] sm:$0xff]  ;;  %v2146_v10 = vld [vmem:[%s4050_s3 + $0x218] sm:$0xff]  ;;  %v1747_v14 = vld [vmem:[%s4051_s4] sm:$0xff] }
  0x3c   : > { %2079 = vmatmul.mubr.msk.f32.gmra.mrb[6].mxu0 %vm392_vm0, %v339_v30  ;;  %v2145_v11 = vld [vmem:[%s4050_s3 + $0x210] sm:$0xff]  ;;  %v1750_v15 = vld [vmem:[%s4051_s4 + $0x18] sm:$0xff]  ;;  %v2108_v17 = vld [vmem:[%s4050_s3 + $0xe8] sm:$0xff] }
  0x3d   : > { %505 = vmatprep.mubr.f32.mxu0 %v4056_v12  ;;  %v1749_v16 = vld [vmem:[%s4051_s4 + $0x10] sm:$0xff]  ;;  %v2107_v18 = vld [vmem:[%s4050_s3 + $0xe0] sm:$0xff]  ;;  %v2116_v19 = vld [vmem:[%s4050_s3 + $0x128] sm:$0xff] }
  0x3e   : > { %v2115_v20 = vld [vmem:[%s4050_s3 + $0x120] sm:$0xff] }
  0x3f   : > { %775 = vperm.xlu1 %2222, %v745_v31   ;;  %770 = vperm.xlu0 %2221, %v744_v32   ;;  %v2131_v21 = vld [vmem:[%s4050_s3 + $0x1a0] sm:$0xff] }
  0x40   : > { %2080 = vmatmul.mubr.msk.f32.gmra.mrb[8].mxu0 %vm392_vm0, %v340_v33 }
  0x43   : > { %785 = vperm.xlu1 %2222, %v747_v34   ;;  %780 = vperm.xlu0 %2221, %v746_v35  }
  0x47   : > { %868 = vperm.xlu1 %2222, %v2088_v36   ;;  %863 = vperm.xlu0 %2221, %v2087_v37  }
  0x4b   : > { %878 = vperm.xlu1 %2222, %v2090_v38   ;;  %873 = vperm.xlu0 %2221, %v2089_v39  }
  0x4f   : > { %888 = vperm.xlu1 %2222, %v2092_v40   ;;  %883 = vperm.xlu0 %2221, %v2091_v41  }
  0x53   : > { %898 = vperm.xlu1 %2222, %v2094_v42   ;;  %893 = vperm.xlu0 %2221, %v2093_v43  }
  0x57   : > { %997 = vperm.xlu1 %2222, %v2096_v44   ;;  %992 = vperm.xlu0 %2221, %v2095_v45  }
  0x5b   : > { %1007 = vperm.xlu1 %2222, %v2098_v46   ;;  %1002 = vperm.xlu0 %2221, %v2097_v47  }
  0x5f   : > { %1017 = vperm.xlu1 %2222, %v2100_v48   ;;  %1012 = vperm.xlu0 %2221, %v2099_v49  }
  0x63   : > { %1027 = vperm.xlu1 %2222, %v2102_v50   ;;  %1022 = vperm.xlu0 %2221, %v2101_v51  }
  0x67   : > { %1105 = vperm.xlu1 %2222, %v2104_v52   ;;  %1100 = vperm.xlu0 %2221, %v2103_v53  }
  0x6b   : > { %1170 = vperm.xlu1 %2222, %v2112_v54   ;;  %1165 = vperm.xlu0 %2221, %v2111_v55  }
  0x6f   : > { %1397 = vperm.xlu1 %2222, %v2128_v56   ;;  %1392 = vperm.xlu0 %2221, %v2127_v57  }
  0x73   : > { %1510 = vperm.xlu1 %2222, %v2136_v58   ;;  %1505 = vperm.xlu0 %2221, %v2135_v59  }
  0x77   : > { %1251 = vperm.xlu1 %2222, %v2120_v60   ;;  %1246 = vperm.xlu0 %2221, %v2119_v61  }
  0x7b   : > { %1639 = vperm.xlu1 %2222, %v2144_v62   ;;  %1634 = vperm.xlu0 %2221, %v2143_v63  }
  0x7f   : > { %1115 = vperm.xlu1 %2222, %v2106_v0   ;;  %1110 = vperm.xlu0 %2221, %v2105_v1  }
  0x83   : > { %1180 = vperm.xlu1 %2222, %v2114_v2   ;;  %1175 = vperm.xlu0 %2221, %v2113_v3  }
  0x87   : > { %1407 = vperm.xlu1 %2222, %v2130_v4   ;;  %1402 = vperm.xlu0 %2221, %v2129_v5  }
  0x8b   : > { %1520 = vperm.xlu1 %2222, %v2138_v6   ;;  %1515 = vperm.xlu0 %2221, %v2137_v7  }
  0x8f   : > { %1261 = vperm.xlu1 %2222, %v2122_v8   ;;  %1256 = vperm.xlu0 %2221, %v2121_v9  }
  0x93   : > { %1649 = vperm.xlu1 %2222, %v2146_v10   ;;  %1644 = vperm.xlu0 %2221, %v2145_v11  }
  0x97   : > { %1762 = vperm.xlu1 %2222, %v1748_v13   ;;  %1757 = vperm.xlu0 %2221, %v1747_v14  }
  0x9b   : > { %1772 = vperm.xlu1 %2222, %v1750_v15   ;;  %1767 = vperm.xlu0 %2221, %v1749_v16  }
  0x9f   : > { %1125 = vperm.xlu1 %2222, %v2108_v17   ;;  %1120 = vperm.xlu0 %2221, %v2107_v18  }
  0xa3   : > { %1190 = vperm.xlu1 %2222, %v2116_v19   ;;  %1185 = vperm.xlu0 %2221, %v2115_v20  }
  0xa6   : > { %v2655_v22 = vpop.permute.xlu0 %354  ;;  %v2657_v23 = vpop.permute.xlu1 %364 }
  0xa7   : > { %1412 = vperm.xlu0 %2221, %v2131_v21  }
  0xaa   : > { %v2659_v24 = vpop.permute.xlu0 %359  ;;  %v2661_v25 = vpop.permute.xlu1 %369 }
  0xae   : > { %v2663_v26 = vpop.permute.xlu0 %374  ;;  %v380_v27 = vpop.permute.xlu1 %379 }
  0xb2   : > { %v2665_v28 = vpop.permute.xlu0 %384  ;;  %v2667_v29 = vpop.permute.xlu1 %389 }
  0xb6   : > { %v2669_v30 = vpop.permute.xlu0 %750  ;;  %v2671_v31 = vpop.permute.xlu1 %755 }
  0xb7   : > { %4116 = vst [vmem:[#allocation6_spill] sm:$0xff] %v2671_v31 }
  0xba   : > { %v2673_v32 = vpop.permute.xlu0 %760  ;;  %v2675_v33 = vpop.permute.xlu1 %765 }
  0xbb   : > { %4117 = vst [vmem:[#allocation7_spill] sm:$0xff] %v2673_v32  ;;  %4118 = vst [vmem:[#allocation8_spill] sm:$0xff] %v2675_v33  ;;  %v2123_v33 = vld [vmem:[%s4050_s3 + $0x160] sm:$0xff] }
  0xbe   : > { %v2677_v34 = vpop.permute.xlu0 %770  ;;  %v2679_v35 = vpop.permute.xlu1 %775 }
  0xbf   : > { %4119 = vst [vmem:[#allocation9_spill] sm:$0xff] %v2677_v34 }
  0xc2   : > { %v2681_v36 = vpop.permute.xlu0 %780  ;;  %v2683_v37 = vpop.permute.xlu1 %785 }
  0xc3   : > { %4120 = vst [vmem:[#allocation10_spill] sm:$0xff] %v2681_v36  ;;  %4121 = vst [vmem:[#allocation11_spill] sm:$0xff] %v2683_v37 }
  0xc6   : > { %v2685_v38 = vpop.permute.xlu0 %863  ;;  %v2687_v39 = vpop.permute.xlu1 %868 }
  0xc7   : > { %4122 = vst [vmem:[#allocation12_spill] sm:$0xff] %v2687_v39 }
  0xca   : > { %v2689_v40 = vpop.permute.xlu0 %873  ;;  %v2691_v41 = vpop.permute.xlu1 %878 }
  0xcb   : > { %4123 = vst [vmem:[#allocation13_spill] sm:$0xff] %v2689_v40  ;;  %4124 = vst [vmem:[#allocation14_spill] sm:$0xff] %v2691_v41 }
  0xce   : > { %v2693_v42 = vpop.permute.xlu0 %883  ;;  %v2695_v43 = vpop.permute.xlu1 %888 }
  0xcf   : > { %4125 = vst [vmem:[#allocation15_spill] sm:$0xff] %v2693_v42 }
  0xd2   : > { %v2697_v44 = vpop.permute.xlu0 %893  ;;  %v2699_v45 = vpop.permute.xlu1 %898 }
  0xd3   : > { %4126 = vst [vmem:[#allocation16_spill] sm:$0xff] %v2697_v44  ;;  %4127 = vst [vmem:[#allocation17_spill] sm:$0xff] %v2699_v45 }
  0xd6   : > { %v2701_v46 = vpop.permute.xlu0 %992  ;;  %v2703_v47 = vpop.permute.xlu1 %997 }
  0xd7   : > { %4128 = vst [vmem:[#allocation18_spill] sm:$0xff] %v2701_v46  ;;  %4129 = vst [vmem:[#allocation19_spill] sm:$0xff] %v2703_v47 }
  0xda   : > { %v2705_v48 = vpop.permute.xlu0 %1002  ;;  %v2712_v55 = vpop.permute.xlu1 %1007 }
  0xdb   : > { %4130 = vst [vmem:[#allocation20_spill] sm:$0xff] %v2705_v48  ;;  %4131 = vst [vmem:[#allocation21_spill] sm:$0xff] %v2712_v55  ;;  %v2124_v48 = vld [vmem:[%s4050_s3 + $0x168] sm:$0xff] }
  0xde   : > { %v2714_v56 = vpop.permute.xlu0 %1012  ;;  %v2728_v1 = vpop.permute.xlu1 %1017 }
  0xdf   : > { %4132 = vst [vmem:[#allocation22_spill] sm:$0xff] %v2714_v56  ;;  %4133 = vst [vmem:[#allocation23_spill] sm:$0xff] %v2728_v1 }
  0xe2   : > { %v2730_v2 = vpop.permute.xlu0 %1022  ;;  %v2746_v6 = vpop.permute.xlu1 %1027 }
  0xe3   : > { %4134 = vst [vmem:[#allocation24_spill] sm:$0xff] %v2730_v2  ;;  %4135 = vst [vmem:[#allocation25_spill] sm:$0xff] %v2746_v6 }
  0xe6   : > { %v2750_v8 = vpop.permute.xlu0 %1100  ;;  %v2761_v11 = vpop.permute.xlu1 %1105 }
  0xea   : > { %v2763_v13 = vpop.permute.xlu0 %1165  ;;  %v2776_v15 = vpop.permute.xlu1 %1170 }
  0xee   : > { %v2778_v16 = vpop.permute.xlu0 %1392  ;;  %v2787_v18 = vpop.permute.xlu1 %1397 }
  0xef   : > { %4136 = vst [vmem:[#allocation26_spill] sm:$0xff] %v2778_v16  ;;  %4137 = vst [vmem:[#allocation27_spill] sm:$0xff] %v2787_v18  ;;  %v2084_v18 = vld [vmem:[%s4052_s5 + $0x2] sm:$0x3] }
  0xf2   : > { %v2789_v19 = vpop.permute.xlu0 %1505  ;;  %v2799_v20 = vpop.permute.xlu1 %1510 }
  0xf3   : > { %4138 = vst [vmem:[#allocation28_spill] sm:$0xff] %v2789_v19  ;;  %4139 = vst [vmem:[#allocation29_spill] sm:$0xff] %v2799_v20 }
  0xf6   : > { %v2801_v21 = vpop.permute.xlu0 %1246 }
 0x103   : > { %v483_v49 = vpop.f32.mrb[0].mxu0  ;;  %v513_v50 = vpop.f32.mrb[0].mxu1 }
 0x104   : > { %v2708_v51 = vadd.f32 %v483_v49, %v2655_v22  ;;  %v2710_v52 = vadd.f32 %v513_v50, %v380_v27  ;;  %v485_v53 = vpop.f32.mrb[1].mxu0  ;;  %v515_v54 = vpop.f32.mrb[1].mxu1 }
 0x105   : > { %v2738_v4 = vadd.f32 %v515_v54, %v380_v27  ;;  %v2753_v9 = vadd.f32 %v485_v53, %v2655_v22  ;;  %v2813_v49 = vpop.permute.xlu1 %1251  ;;  %v2815_v50 = vpop.permute.xlu0 %1634 }
 0x106   : > { %547 = vrot.lane.b32.xlu1 %v2710_v52, %s2305_s17  ;;  %537 = vrot.lane.b32.xlu0 %v2708_v51, %s2305_s17  ;;  %4140 = vst [vmem:[#allocation30_spill] sm:$0xff] %v2815_v50 }
 0x107   : > { %v489_v57 = vpop.f32.mrb[2].mxu0  ;;  %v519_v58 = vpop.f32.mrb[2].mxu1 }
 0x108   : > { %v491_v59 = vpop.f32.mrb[3].mxu0  ;;  %v521_v60 = vpop.f32.mrb[3].mxu1  ;;  %v2770_v14 = vadd.f32 %v489_v57, %v2659_v24  ;;  %v2785_v17 = vadd.f32 %v519_v58, %v2665_v28 }
 0x109   : > { %v2804_v22 = vadd.f32 %v491_v59, %v2659_v24  ;;  %v2811_v27 = vadd.f32 %v521_v60, %v2665_v28  ;;  %v2825_v24 = vpop.permute.xlu1 %1639  ;;  %v2827_v28 = vpop.permute.xlu0 %1110 }
 0x10a   : > { %625 = vrot.lane.b32.xlu1 %v2710_v52, %s2306_s18  ;;  %615 = vrot.lane.b32.xlu0 %v2708_v51, %s2306_s18  ;;  %4141 = vst [vmem:[#allocation31_spill] sm:$0xff] %v2825_v24 }
 0x10b   : > { %v495_v61 = vpop.f32.mrb[4].mxu0  ;;  %v525_v62 = vpop.f32.mrb[4].mxu1 }
 0x10c   : > { %v2724_v63 = vpop.f32.mrb[5].mxu0  ;;  %v2726_v0 = vpop.f32.mrb[5].mxu1  ;;  %v2834_v53 = vadd.f32 %v495_v61, %v2657_v23  ;;  %v2837_v54 = vadd.f32 %v525_v62, %v2667_v29 }
 0x10d   : > { %v2839_v57 = vpop.permute.xlu1 %1115  ;;  %v2841_v58 = vpop.permute.xlu0 %1175  ;;  %v2861_v61 = vadd.f32 %v2726_v0, %v2667_v29  ;;  %v2873_v56 = vadd.f32 %v2724_v63, %v2657_v23 }
 0x10e   : > { %814 = vrot.lane.b32.xlu1 %v2710_v52, %s2307_s19  ;;  %804 = vrot.lane.b32.xlu0 %v2708_v51, %s2307_s19  ;;  %4142 = vst [vmem:[#allocation32_spill] sm:$0xff] %v2837_v54 }
 0x10f   : > { %v2736_v3 = vpop.f32.mrb[6].mxu0  ;;  %4144 = vst [vmem:[#allocation34_spill] sm:$0xff] %v2861_v61 }
 0x110   : > { %v2740_v5 = vpop.f32.mrb[7].mxu0  ;;  %v2889_v23 = vadd.f32 %v2736_v3, %v2661_v25 }
 0x111   : > { %v2851_v59 = vpop.permute.xlu1 %1180  ;;  %v2853_v60 = vpop.permute.xlu0 %1402 }
 0x112   : > { %563 = vrot.lane.b32.xlu1 %v2738_v4, %s2305_s17  ;;  %1446 = vrot.lane.b32.xlu0 %v2708_v51, %s2308_s20  ;;  %4143 = vst [vmem:[#allocation33_spill] sm:$0xff] %v2853_v60 }
 0x113   : > { %v2748_v7 = vpop.f32.mrb[8].mxu0 }
 0x114   : > { %v2755_v10 = vpop.f32.mrb[9].mxu0  ;;  %v2907_v3 = vadd.f32 %v2748_v7, %v2663_v26  ;;  %v2925_v7 = vadd.f32 %v2740_v5, %v2661_v25 }
 0x115   : > { %v2863_v62 = vpop.permute.xlu1 %1407  ;;  %v2865_v12 = vpop.permute.xlu0 %1515 }
 0x116   : > { %641 = vrot.lane.b32.xlu1 %v2738_v4, %s2306_s18  ;;  %553 = vrot.lane.b32.xlu0 %v2753_v9, %s2305_s17  ;;  %4145 = vst [vmem:[#allocation35_spill] sm:$0xff] %v2863_v62  ;;  %4146 = vst [vmem:[#allocation36_spill] sm:$0xff] %v2865_v12  ;;  %v569_v12 = vlaneseq }
 0x118   : > { %v590_v6 = vshrl.u32 %v569_v12, 7  ;;  %v2977_v32 = vand.u32 127, %v569_v12  ;;  %v2110_v12 = vld [vmem:[%s4050_s3 + $0xf8] sm:$0xff] }
 0x119   : > { %v2879_v29 = vpop.permute.xlu1 %1520  ;;  %v2881_v0 = vpop.permute.xlu0 %1256 }
 0x11a   : > { %830 = vrot.lane.b32.xlu1 %v2738_v4, %s2307_s19  ;;  %631 = vrot.lane.b32.xlu0 %v2753_v9, %s2306_s18  ;;  %4147 = vst [vmem:[#allocation37_spill] sm:$0xff] %v2879_v29  ;;  %v2989_v45 = vsub.s32 0, %v590_v6  ;;  %vm571_vm1 = vcmp.lt.s32.totalorder %v2977_v32, 1  ;;  %v3004_v24 = vsub.s32 1, %v590_v6  ;;  %vm647_vm2 = vcmp.lt.s32.totalorder %v2977_v32, 127 }
 0x11b   : > { %vm723_vm3 = vcmp.lt.s32.totalorder %v2977_v32, 16  ;;  %vm1364_vm4 = vcmp.lt.s32.totalorder %v2977_v32, 112 }
 0x11c   : > { %v3046_v16 = vrot.slane %v2084_v18, %v3004_v24 }
 0x11d   : > { %v2891_v63 = vpop.permute.xlu1 %1261  ;;  %v2893_v62 = vpop.permute.xlu0 %1644 }
 0x11e   : > { %539 = vrot.lane.b32.xlu1 %v2770_v14, %s2305_s17  ;;  %820 = vrot.lane.b32.xlu0 %v2753_v9, %s2307_s19  ;;  %4148 = vst [vmem:[#allocation38_spill] sm:$0xff] %v2893_v62  ;;  %v2140_v62 = vld [vmem:[%s4050_s3 + $0x1e8] sm:$0xff] }
 0x121   : > { %v2903_v29 = vpop.permute.xlu1 %1649  ;;  %v2909_v34 = vpop.permute.xlu0 %1757 }
 0x122   : > { %617 = vrot.lane.b32.xlu1 %v2770_v14, %s2306_s18  ;;  %1462 = vrot.lane.b32.xlu0 %v2753_v9, %s2308_s20  ;;  %4149 = vst [vmem:[#allocation39_spill] sm:$0xff] %v2903_v29  ;;  %4150 = vst [vmem:[#allocation40_spill] sm:$0xff] %v2909_v34 }
 0x125   : > { %v2915_v42 = vpop.permute.xlu1 %1762  ;;  %v2917_v55 = vpop.permute.xlu0 %1767 }
 0x126   : > { %806 = vrot.lane.b32.xlu1 %v2770_v14, %s2307_s19  ;;  %549 = vrot.lane.b32.xlu0 %v2785_v17, %s2305_s17  ;;  %4151 = vst [vmem:[#allocation41_spill] sm:$0xff] %v2915_v42  ;;  %4152 = vst [vmem:[#allocation42_spill] sm:$0xff] %v2917_v55  ;;  %v2933_v42 = vadd.f32 %v2755_v10, %v2663_v26  ;;  %v2132_v26 = vld [vmem:[%s4050_s3 + $0x1a8] sm:$0xff]  ;;  %v2139_v10 = vld [vmem:[%s4050_s3 + $0x1e0] sm:$0xff] }
 0x129   : > { %v2935_v55 = vpop.permute.xlu1 %1772  ;;  %v2937_v34 = vpop.permute.xlu0 %1120 }
 0x12a   : > { %1448 = vrot.lane.b32.xlu1 %v2770_v14, %s2308_s20  ;;  %627 = vrot.lane.b32.xlu0 %v2785_v17, %s2306_s18  ;;  %4153 = vst [vmem:[#allocation43_spill] sm:$0xff] %v2935_v55 }
 0x12d   : > { %v2943_v25 = vpop.permute.xlu1 %1125  ;;  %v2945_v5 = vpop.permute.xlu0 %1185 }
 0x12e   : > { %555 = vrot.lane.b32.xlu1 %v2804_v22, %s2305_s17  ;;  %816 = vrot.lane.b32.xlu0 %v2785_v17, %s2307_s19 }
 0x131   : > { %v2961_v55 = vpop.permute.xlu1 %1190  ;;  %v2963_v29 = vpop.permute.xlu0 %1412 }
 0x132   : > { %633 = vrot.lane.b32.xlu1 %v2804_v22, %s2306_s18  ;;  %565 = vrot.lane.b32.xlu0 %v2811_v27, %s2305_s17  ;;  %4154 = vst [vmem:[#allocation44_spill] sm:$0xff] %v2963_v29 }
 0x136   : > { %822 = vrot.lane.b32.xlu1 %v2804_v22, %s2307_s19  ;;  %643 = vrot.lane.b32.xlu0 %v2811_v27, %s2306_s18 }
 0x13a   : > { %1464 = vrot.lane.b32.xlu1 %v2804_v22, %s2308_s20  ;;  %832 = vrot.lane.b32.xlu0 %v2811_v27, %s2307_s19 }
 0x13e   : > { %551 = vrot.lane.b32.xlu1 %v2837_v54, %s2305_s17  ;;  %541 = vrot.lane.b32.xlu0 %v2834_v53, %s2305_s17 }
 0x142   : > { %629 = vrot.lane.b32.xlu1 %v2837_v54, %s2306_s18  ;;  %619 = vrot.lane.b32.xlu0 %v2834_v53, %s2306_s18 }
 0x146   : > { %818 = vrot.lane.b32.xlu1 %v2837_v54, %s2307_s19  ;;  %808 = vrot.lane.b32.xlu0 %v2834_v53, %s2307_s19 }
 0x14a   : > { %567 = vrot.lane.b32.xlu1 %v2861_v61, %s2305_s17  ;;  %1450 = vrot.lane.b32.xlu0 %v2834_v53, %s2308_s20 }
 0x14e   : > { %645 = vrot.lane.b32.xlu1 %v2861_v61, %s2306_s18  ;;  %557 = vrot.lane.b32.xlu0 %v2873_v56, %s2305_s17 }
 0x152   : > { %834 = vrot.lane.b32.xlu1 %v2861_v61, %s2307_s19  ;;  %635 = vrot.lane.b32.xlu0 %v2873_v56, %s2306_s18 }
 0x156   : > { %543 = vrot.lane.b32.xlu1 %v2889_v23, %s2305_s17  ;;  %824 = vrot.lane.b32.xlu0 %v2873_v56, %s2307_s19 }
 0x15a   : > { %621 = vrot.lane.b32.xlu1 %v2889_v23, %s2306_s18  ;;  %1466 = vrot.lane.b32.xlu0 %v2873_v56, %s2308_s20 }
 0x15e   : > { %810 = vrot.lane.b32.xlu1 %v2889_v23, %s2307_s19  ;;  %545 = vrot.lane.b32.xlu0 %v2907_v3, %s2305_s17 }
 0x162   : > { %1452 = vrot.lane.b32.xlu1 %v2889_v23, %s2308_s20  ;;  %623 = vrot.lane.b32.xlu0 %v2907_v3, %s2306_s18 }
 0x166   : > { %559 = vrot.lane.b32.xlu1 %v2925_v7, %s2305_s17  ;;  %812 = vrot.lane.b32.xlu0 %v2907_v3, %s2307_s19 }
 0x16a   : > { %637 = vrot.lane.b32.xlu1 %v2925_v7, %s2306_s18  ;;  %561 = vrot.lane.b32.xlu0 %v2933_v42, %s2305_s17  ;;  %s329_s17 = scalar_lea.vmem [#allocation3], %s2422_s13  ;;  %s4000_s13 = scalar_lea.hbm %s4055_s8, %s2159_s21 }
 0x16e   : > { %826 = vrot.lane.b32.xlu1 %v2925_v7, %s2307_s19  ;;  %639 = vrot.lane.b32.xlu0 %v2933_v42, %s2306_s18  ;;  %s1999_s18 = sshll.u32 %s329_s17, 4  ;;  %s3995_s18 = int_to_ptr.vmem [resolvable:$true] %s1999_s18 }
 0x16f   : > { %s2239_s24 = scalar_lea.vmem %s3995_s18, 512 }
 0x170   : > { %p2240_p13 = scmp.ne.s32.totalorder %s3995_s18, %s2239_s24 }
 0x172   : > { %1468 = vrot.lane.b32.xlu1 %v2925_v7, %s2308_s20  ;;  %828 = vrot.lane.b32.xlu0 %v2933_v42, %s2307_s19  ;;  %p2241_p0 = pnand %p2240_p13, %p2395_p6 }
 0x174   : > { %p2242_p1 = pneg %p2241_p0 }
 0x176   : > { %1417 = vperm.xlu1 %2222, %v2132_v26   ;;  %1525 = vperm.xlu0 %2221, %v2139_v10   ;;  %v2147_v26 = vld [vmem:[%s4050_s3 + $0x220] sm:$0xff] }
 0x178   : > { %v548_v41 = vpop.permute.xlu1 %547  ;;  %v538_v60 = vpop.permute.xlu0 %537 }
 0x17a   : > { %1530 = vperm.xlu1 %2222, %v2140_v62   ;;  %1266 = vperm.xlu0 %2221, %v2123_v33   ;;  %v2148_v62 = vld [vmem:[%s4050_s3 + $0x228] sm:$0xff]  ;;  %v2109_v33 = vld [vmem:[%s4050_s3 + $0xf0] sm:$0xff] }
 0x17c   : > { %v626_v10 = vpop.permute.xlu1 %625  ;;  %v616_v29 = vpop.permute.xlu0 %615 }
 0x17e   : > { %1271 = vperm.xlu1 %2222, %v2124_v48   ;;  %1654 = vperm.xlu0 %2221, %v2147_v26   ;;  %v530_v48 = vld [vmem:[%s4052_s5] sm:$0x3]  ;;  %v2117_v26 = vld [vmem:[%s4050_s3 + $0x130] sm:$0xff] }
 0x17f   : > { %v3002_v2 = vrot.slane %v530_v48, %v2989_v45 }
 0x180   : > { %v2985_v37 = vpop.permute.xlu1 %814  ;;  %v2987_v40 = vpop.permute.xlu0 %804 }
 0x182   : > { %1659 = vperm.xlu1 %2222, %v2148_v62   ;;  %1130 = vperm.xlu0 %2221, %v2109_v33   ;;  %v3011_v33 = vrot.slane %v530_v48, %v3004_v24 }
 0x184   : > { %v564_v61 = vpop.permute.xlu1 %563  ;;  %v3006_v54 = vpop.permute.xlu0 %1446 }
 0x185   : > { %v585_v62 = vsel %vm571_vm1, %v564_v61, %v548_v41  ;;  %v577_v20 = vsel %vm571_vm1, %v548_v41, %v564_v61  ;;  %v1203_v41 = vmul.f32 %v2763_v13, %v2708_v51 }
 0x186   : > { %1135 = vperm.xlu1 %2222, %v2110_v12   ;;  %1195 = vperm.xlu0 %2221, %v2117_v26   ;;  %v3014_v36 = vmul.f32 %v3002_v2, %v585_v62  ;;  %v3031_v62 = vrot.slane %v2084_v18, %v2989_v45  ;;  %v3036_v61 = vmul.f32 %v3011_v33, %v577_v20 }
 0x188   : > { %v642_v6 = vpop.permute.xlu1 %641  ;;  %v554_v44 = vpop.permute.xlu0 %553 }
 0x189   : > { %v572_v50 = vsel %vm571_vm1, %v538_v60, %v554_v44  ;;  %v580_v12 = vsel %vm571_vm1, %v554_v44, %v538_v60  ;;  %v1204_v44 = vmul.f32 %v2763_v13, %v2753_v9  ;;  %v653_v51 = vsel %vm647_vm2, %v626_v10, %v642_v6 }
 0x18a   : > { %v599_v48 = vmul.f32 %v3002_v2, %v580_v12  ;;  %v600_v26 = vmul.f32 %v3011_v33, %v572_v50  ;;  %701 = vrot.lane.b32.xlu1 %v3014_v36, %s2307_s19  ;;  %v3059_v18 = vmul.f32 %v3031_v62, %v653_v51 }
 0x18c   : > { %v1138_v60 = vmul.f32 %v2750_v8, %v599_v48  ;;  %v1139_v12 = vmul.f32 %v2750_v8, %v600_v26  ;;  %v3042_v50 = vpop.permute.xlu1 %830  ;;  %691 = vrot.lane.b32.xlu0 %v599_v48, %s2307_s19  ;;  %v632_v47 = vpop.permute.xlu0 %631 }
 0x18d   : > { %v648_v20 = vsel %vm647_vm2, %v616_v29, %v632_v47  ;;  %v656_v9 = vsel %vm647_vm2, %v632_v47, %v616_v29  ;;  %v661_v47 = vsel %vm647_vm2, %v642_v6, %v626_v10 }
 0x18e   : > { %v1219_v13 = vadd.f32 %v1203_v41, %v1138_v60  ;;  %v1220_v31 = vadd.f32 %v1204_v44, %v1139_v12  ;;  %717 = vrot.lane.b32.xlu1 %v3036_v61, %s2307_s19  ;;  %v675_v8 = vmul.f32 %v3031_v62, %v648_v20  ;;  %v676_v39 = vmul.f32 %v3046_v16, %v656_v9 }
 0x18f   : > { %v3075_v12 = vmul.f32 %v3046_v16, %v661_v47 }
 0x190   : > { %v540_v19 = vpop.permute.xlu1 %539  ;;  %707 = vrot.lane.b32.xlu0 %v600_v26, %s2307_s19  ;;  %v3062_v46 = vpop.permute.xlu0 %820  ;;  %v1284_v29 = vmul.f32 %v2801_v21, %v675_v8  ;;  %v1285_v41 = vmul.f32 %v2801_v21, %v676_v39 }
 0x192   : > { %943 = vrot.lane.b32.xlu1 %v3059_v18, %s2307_s19  ;;  %v3070_v44 = vadd.f32 %v1285_v41, %v1220_v31  ;;  %v3072_v60 = vadd.f32 %v1284_v29, %v1219_v13 }
 0x194   : > { %4155 = vst [vmem:[#allocation45_spill] sm:$0xff] %v3070_v44  ;;  %4156 = vst [vmem:[#allocation46_spill] sm:$0xff] %v3072_v60  ;;  %v618_v51 = vpop.permute.xlu1 %617  ;;  %933 = vrot.lane.b32.xlu0 %v675_v8, %s2307_s19  ;;  %v3078_v20 = vpop.permute.xlu0 %1462 }
 0x196   : > { %959 = vrot.lane.b32.xlu1 %v3075_v12, %s2307_s19 }
 0x198   : > { %v3082_v10 = vpop.permute.xlu1 %806  ;;  %949 = vrot.lane.b32.xlu0 %v676_v39, %s2307_s19  ;;  %v550_v21 = vpop.permute.xlu0 %549 }
 0x199   : > { %4157 = vst [vmem:[#allocation47_spill] sm:$0xff] %v3082_v10 }
 0x19c   : > { %v3085_v31 = vpop.permute.xlu1 %1448  ;;  %1332 = vrot.lane.b32.xlu0 %v599_v48, %s2308_s20  ;;  %v628_v6 = vpop.permute.xlu0 %627  ;;  %v1206_v48 = vmul.f32 %v2776_v15, %v2804_v22 }
 0x19d   : > { %4158 = vst [vmem:[#allocation48_spill] sm:$0xff] %v3085_v31  ;;  %v1205_v31 = vmul.f32 %v2776_v15, %v2770_v14 }
 0x1a0   : > { %v556_v9 = vpop.permute.xlu1 %555  ;;  %1348 = vrot.lane.b32.xlu0 %v600_v26, %s2308_s20  ;;  %v3089_v13 = vpop.permute.xlu0 %816 }
 0x1a1   : > { %4159 = vst [vmem:[#allocation49_spill] sm:$0xff] %v3089_v13  ;;  %v573_v47 = vsel %vm571_vm1, %v540_v19, %v556_v9  ;;  %v581_v29 = vsel %vm571_vm1, %v556_v9, %v540_v19 }
 0x1a2   : > { %v601_v41 = vmul.f32 %v3002_v2, %v581_v29  ;;  %v602_v44 = vmul.f32 %v3011_v33, %v573_v47 }
 0x1a4   : > { %v1140_v26 = vmul.f32 %v2761_v11, %v601_v41  ;;  %v1141_v13 = vmul.f32 %v2761_v11, %v602_v44  ;;  %693 = vrot.lane.b32.xlu1 %v601_v41, %s2307_s19  ;;  %v634_v60 = vpop.permute.xlu1 %633  ;;  %1575 = vrot.lane.b32.xlu0 %v675_v8, %s2308_s20  ;;  %v566_v19 = vpop.permute.xlu0 %565 }
 0x1a5   : > { %v649_v9 = vsel %vm647_vm2, %v618_v51, %v634_v60  ;;  %v657_v47 = vsel %vm647_vm2, %v634_v60, %v618_v51  ;;  %v586_v11 = vsel %vm571_vm1, %v566_v19, %v550_v21 }
 0x1a6   : > { %v1221_v14 = vadd.f32 %v1205_v31, %v1140_v26  ;;  %v1222_v29 = vadd.f32 %v1206_v48, %v1141_v13  ;;  %v677_v15 = vmul.f32 %v3031_v62, %v649_v9  ;;  %v678_v22 = vmul.f32 %v3046_v16, %v657_v47 }
 0x1a7   : > { %v3120_v51 = vmul.f32 %v3002_v2, %v586_v11  ;;  %v578_v31 = vsel %vm571_vm1, %v550_v21, %v566_v19 }
 0x1a8   : > { %v1286_v10 = vmul.f32 %v2813_v49, %v677_v15  ;;  %v1287_v8 = vmul.f32 %v2813_v49, %v678_v22  ;;  %709 = vrot.lane.b32.xlu1 %v602_v44, %s2307_s19  ;;  %v3116_v1 = vpop.permute.xlu1 %822  ;;  %1591 = vrot.lane.b32.xlu0 %v676_v39, %s2308_s20  ;;  %v644_v60 = vpop.permute.xlu0 %643  ;;  %v3136_v39 = vmul.f32 %v3011_v33, %v578_v31 }
 0x1a9   : > { %v654_v9 = vsel %vm647_vm2, %v628_v6, %v644_v60  ;;  %v662_v47 = vsel %vm647_vm2, %v644_v60, %v628_v6 }
 0x1aa   : > { %v3124_v13 = vadd.f32 %v1287_v8, %v1222_v29  ;;  %v3126_v48 = vadd.f32 %v1286_v10, %v1221_v14  ;;  %v3144_v19 = vmul.f32 %v3031_v62, %v654_v9  ;;  %v3152_v11 = vmul.f32 %v3046_v16, %v662_v47 }
 0x1ac   : > { %4160 = vst [vmem:[#allocation50_spill] sm:$0xff] %v3124_v13  ;;  %4161 = vst [vmem:[#allocation51_spill] sm:$0xff] %v3126_v48  ;;  %935 = vrot.lane.b32.xlu1 %v677_v15, %s2307_s19  ;;  %v3129_v49 = vpop.permute.xlu1 %1464  ;;  %703 = vrot.lane.b32.xlu0 %v3120_v51, %s2307_s19  ;;  %v3133_v26 = vpop.permute.xlu0 %832 }
 0x1ad   : > { %4162 = vst [vmem:[#allocation52_spill] sm:$0xff] %v3144_v19  ;;  %4163 = vst [vmem:[#allocation53_spill] sm:$0xff] %v3152_v11 }
 0x1b0   : > { %951 = vrot.lane.b32.xlu1 %v678_v22, %s2307_s19  ;;  %v552_v21 = vpop.permute.xlu1 %551  ;;  %719 = vrot.lane.b32.xlu0 %v3136_v39, %s2307_s19  ;;  %v542_v10 = vpop.permute.xlu0 %541 }
 0x1b4   : > { %1334 = vrot.lane.b32.xlu1 %v601_v41, %s2308_s20  ;;  %v630_v14 = vpop.permute.xlu1 %629  ;;  %945 = vrot.lane.b32.xlu0 %v3144_v19, %s2307_s19  ;;  %v620_v29 = vpop.permute.xlu0 %619 }
 0x1b8   : > { %1350 = vrot.lane.b32.xlu1 %v602_v44, %s2308_s20  ;;  %v3155_v8 = vpop.permute.xlu1 %818  ;;  %961 = vrot.lane.b32.xlu0 %v3152_v11, %s2307_s19  ;;  %v3159_v31 = vpop.permute.xlu0 %808 }
 0x1b9   : > { %4164 = vst [vmem:[#allocation54_spill] sm:$0xff] %v3155_v8  ;;  %4165 = vst [vmem:[#allocation55_spill] sm:$0xff] %v3159_v31 }
 0x1bc   : > { %1577 = vrot.lane.b32.xlu1 %v677_v15, %s2308_s20  ;;  %v568_v6 = vpop.permute.xlu1 %567  ;;  %v3162_v41 = vpop.permute.xlu0 %1450 }
 0x1bd   : > { %4166 = vst [vmem:[#allocation56_spill] sm:$0xff] %v3162_v41  ;;  %v587_v60 = vsel %vm571_vm1, %v568_v6, %v552_v21  ;;  %v579_v11 = vsel %vm571_vm1, %v552_v21, %v568_v6 }
 0x1be   : > { %v3172_v31 = vmul.f32 %v3002_v2, %v587_v60 }
 0x1c0   : > { %1593 = vrot.lane.b32.xlu1 %v678_v22, %s2308_s20  ;;  %v646_v9 = vpop.permute.xlu1 %645  ;;  %v558_v47 = vpop.permute.xlu0 %557  ;;  %v1207_v22 = vmul.f32 %v2841_v58, %v2834_v53  ;;  %v3192_v53 = vmul.f32 %v3011_v33, %v579_v11 }
 0x1c1   : > { %v574_v44 = vsel %vm571_vm1, %v542_v10, %v558_v47  ;;  %v582_v8 = vsel %vm571_vm1, %v558_v47, %v542_v10  ;;  %v655_v47 = vsel %vm647_vm2, %v630_v14, %v646_v9 }
 0x1c2   : > { %v603_v15 = vmul.f32 %v3002_v2, %v582_v8  ;;  %v604_v41 = vmul.f32 %v3011_v33, %v574_v44  ;;  %v1208_v44 = vmul.f32 %v2841_v58, %v2873_v56  ;;  %v663_v56 = vsel %vm647_vm2, %v646_v9, %v630_v14 }
 0x1c4   : > { %v1142_v19 = vmul.f32 %v2827_v28, %v603_v15  ;;  %705 = vrot.lane.b32.xlu1 %v3172_v31, %s2307_s19  ;;  %v3183_v13 = vpop.permute.xlu1 %834  ;;  %695 = vrot.lane.b32.xlu0 %v603_v15, %s2307_s19  ;;  %v636_v10 = vpop.permute.xlu0 %635  ;;  %v1143_v8 = vmul.f32 %v2827_v28, %v604_v41 }
 0x1c5   : > { %4167 = vst [vmem:[#allocation57_spill] sm:$0xff] %v3183_v13  ;;  %v650_v60 = vsel %vm647_vm2, %v620_v29, %v636_v10  ;;  %v658_v21 = vsel %vm647_vm2, %v636_v10, %v620_v29  ;;  %v3208_v10 = vmul.f32 %v3031_v62, %v655_v47 }
 0x1c6   : > { %v1223_v6 = vadd.f32 %v1207_v22, %v1142_v19  ;;  %v679_v13 = vmul.f32 %v3031_v62, %v650_v60  ;;  %v680_v28 = vmul.f32 %v3046_v16, %v658_v21  ;;  %v1224_v11 = vadd.f32 %v1208_v44, %v1143_v8 }
 0x1c8   : > { %721 = vrot.lane.b32.xlu1 %v3192_v53, %s2307_s19  ;;  %v544_v48 = vpop.permute.xlu1 %543  ;;  %711 = vrot.lane.b32.xlu0 %v604_v41, %s2307_s19  ;;  %v3203_v29 = vpop.permute.xlu0 %824  ;;  %v1288_v19 = vmul.f32 %v2881_v0, %v679_v13  ;;  %v1289_v22 = vmul.f32 %v2881_v0, %v680_v28  ;;  %v3222_v0 = vmul.f32 %v3046_v16, %v663_v56 }
 0x1ca   : > { %v3212_v58 = vadd.f32 %v1288_v19, %v1223_v6  ;;  %v3214_v60 = vadd.f32 %v1289_v22, %v1224_v11  ;;  %4171 = vst [vmem:[#allocation61_spill] sm:$0xff] %v3222_v0 }
 0x1cc   : > { %4168 = vst [vmem:[#allocation58_spill] sm:$0xff] %v3212_v58  ;;  %4169 = vst [vmem:[#allocation59_spill] sm:$0xff] %v3214_v60  ;;  %947 = vrot.lane.b32.xlu1 %v3208_v10, %s2307_s19  ;;  %v622_v21 = vpop.permute.xlu1 %621  ;;  %937 = vrot.lane.b32.xlu0 %v679_v13, %s2307_s19  ;;  %v3219_v8 = vpop.permute.xlu0 %1466 }
 0x1cd   : > { %4170 = vst [vmem:[#allocation60_spill] sm:$0xff] %v3219_v8 }
 0x1d0   : > { %963 = vrot.lane.b32.xlu1 %v3222_v0, %s2307_s19  ;;  %v3226_v47 = vpop.permute.xlu1 %810  ;;  %953 = vrot.lane.b32.xlu0 %v680_v28, %s2307_s19  ;;  %v546_v14 = vpop.permute.xlu0 %545 }
 0x1d1   : > { %4172 = vst [vmem:[#allocation62_spill] sm:$0xff] %v3226_v47 }
 0x1d4   : > { %v3229_v9 = vpop.permute.xlu1 %1452  ;;  %1336 = vrot.lane.b32.xlu0 %v603_v15, %s2308_s20  ;;  %v624_v6 = vpop.permute.xlu0 %623 }
 0x1d5   : > { %4173 = vst [vmem:[#allocation63_spill] sm:$0xff] %v3229_v9 }
 0x1d8   : > { %v560_v44 = vpop.permute.xlu1 %559  ;;  %1352 = vrot.lane.b32.xlu0 %v604_v41, %s2308_s20  ;;  %v813_v11 = vpop.permute.xlu0 %812 }
 0x1d9   : > { %v575_v19 = vsel %vm571_vm1, %v544_v48, %v560_v44  ;;  %v583_v22 = vsel %vm571_vm1, %v560_v44, %v544_v48 }
 0x1da   : > { %v605_v56 = vmul.f32 %v3002_v2, %v583_v22  ;;  %v606_v47 = vmul.f32 %v3011_v33, %v575_v19  ;;  %v1209_v22 = vmul.f32 %v2851_v59, %v2889_v23 }
 0x1dc   : > { %697 = vrot.lane.b32.xlu1 %v605_v56, %s2307_s19  ;;  %v638_v9 = vpop.permute.xlu1 %637  ;;  %1579 = vrot.lane.b32.xlu0 %v679_v13, %s2308_s20  ;;  %v562_v15 = vpop.permute.xlu0 %561  ;;  %v1144_v60 = vmul.f32 %v2839_v57, %v605_v56  ;;  %v1145_v41 = vmul.f32 %v2839_v57, %v606_v47  ;;  %v1210_v13 = vmul.f32 %v2851_v59, %v2925_v7 }
 0x1dd   : > { %v651_v58 = vsel %vm647_vm2, %v622_v21, %v638_v9  ;;  %v659_v48 = vsel %vm647_vm2, %v638_v9, %v622_v21  ;;  %v584_v8 = vsel %vm571_vm1, %v562_v15, %v546_v14  ;;  %v576_v23 = vsel %vm571_vm1, %v546_v14, %v562_v15 }
 0x1de   : > { %v681_v44 = vmul.f32 %v3031_v62, %v651_v58  ;;  %v682_v19 = vmul.f32 %v3046_v16, %v659_v48  ;;  %v1225_v21 = vadd.f32 %v1209_v22, %v1144_v60  ;;  %v1226_v9 = vadd.f32 %v1210_v13, %v1145_v41 }
 0x1df   : > { %v607_v48 = vmul.f32 %v3002_v2, %v584_v8  ;;  %v608_v60 = vmul.f32 %v3011_v33, %v576_v23  ;;  %v1211_v22 = vmul.f32 %v2945_v5, %v2907_v3  ;;  %v1212_v13 = vmul.f32 %v2945_v5, %v2933_v42 }
 0x1e0   : > { %v1290_v57 = vmul.f32 %v2891_v63, %v681_v44  ;;  %v1291_v0 = vmul.f32 %v2891_v63, %v682_v19  ;;  %713 = vrot.lane.b32.xlu1 %v606_v47, %s2307_s19  ;;  %1595 = vrot.lane.b32.xlu0 %v680_v28, %s2308_s20  ;;  %v640_v58 = vpop.permute.xlu0 %639  ;;  %v3285_v14 = vpop.permute.xlu1 %826 }
 0x1e1   : > { %v652_v8 = vsel %vm647_vm2, %v624_v6, %v640_v58  ;;  %v660_v15 = vsel %vm647_vm2, %v640_v58, %v624_v6  ;;  %v1147_v41 = vmul.f32 %v2937_v34, %v608_v60  ;;  %v2118_v58 = vld [vmem:[%s4050_s3 + $0x138] sm:$0xff] }
 0x1e2   : > { %v3262_v59 = vadd.f32 %v1290_v57, %v1225_v21  ;;  %v3264_v7 = vadd.f32 %v1291_v0, %v1226_v9  ;;  %v3283_v0 = vmul.f32 %v3031_v62, %v652_v8  ;;  %v3293_v33 = vmul.f32 %v3046_v16, %v660_v15  ;;  %v2141_v16 = vld [vmem:[%s4050_s3 + $0x1f0] sm:$0xff] }
 0x1e3   : > { %v1228_v9 = vadd.f32 %v1212_v13, %v1147_v41  ;;  %v2142_v41 = vld [vmem:[%s4050_s3 + $0x1f8] sm:$0xff] }
 0x1e4   : > { %939 = vrot.lane.b32.xlu1 %v681_v44, %s2307_s19  ;;  %699 = vrot.lane.b32.xlu0 %v607_v48, %s2307_s19  ;;  %v829_v63 = vpop.permute.xlu0 %828  ;;  %v3298_v62 = vpop.permute.xlu1 %1468 }
 0x1e5   : > { %v3271_v28 = vsel %vm723_vm3, %v813_v11, %v829_v63  ;;  %v3275_v2 = vsel %vm723_vm3, %v829_v63, %v813_v11  ;;  %v2133_v11 = vld [vmem:[%s4050_s3 + $0x1b0] sm:$0xff] }
 0x1e8   : > { %955 = vrot.lane.b32.xlu1 %v682_v19, %s2307_s19  ;;  %715 = vrot.lane.b32.xlu0 %v608_v60, %s2307_s19 }
 0x1ec   : > { %1338 = vrot.lane.b32.xlu1 %v605_v56, %s2308_s20  ;;  %941 = vrot.lane.b32.xlu0 %v3283_v0, %s2307_s19 }
 0x1f0   : > { %1354 = vrot.lane.b32.xlu1 %v606_v47, %s2308_s20  ;;  %957 = vrot.lane.b32.xlu0 %v3293_v33, %s2307_s19  ;;  %v1146_v47 = vmul.f32 %v2937_v34, %v607_v48  ;;  %v2125_v34 = vld [vmem:[%s4050_s3 + $0x170] sm:$0xff] }
 0x1f2   : > { %v1227_v21 = vadd.f32 %v1211_v22, %v1146_v47 }
 0x1f4   : > { %1581 = vrot.lane.b32.xlu1 %v681_v44, %s2308_s20  ;;  %1422 = vperm.xlu0 %2221, %v2133_v11   ;;  %v2134_v11 = vld [vmem:[%s4050_s3 + $0x1b8] sm:$0xff] }
 0x1f5   : > { %v3304_v6 = vpop.permute.xlu1 %1417  ;;  %v3306_v56 = vpop.permute.xlu0 %1525 }
 0x1f8   : > { %1597 = vrot.lane.b32.xlu1 %v682_v19, %s2308_s20  ;;  %1535 = vperm.xlu0 %2221, %v2141_v16  }
 0x1f9   : > { %v3318_v44 = vpop.permute.xlu1 %1530  ;;  %v1267_v57 = vpop.permute.xlu0 %1266 }
 0x1fa   : > { %v1292_v23 = vmul.f32 %v1267_v57, %v3283_v0  ;;  %v1293_v5 = vmul.f32 %v1267_v57, %v3293_v33  ;;  %v2126_v57 = vld [vmem:[%s4050_s3 + $0x178] sm:$0xff] }
 0x1fc   : > { %v3328_v63 = vadd.f32 %v1292_v23, %v1227_v21  ;;  %v3330_v19 = vadd.f32 %v1293_v5, %v1228_v9  ;;  %1200 = vperm.xlu1 %2222, %v2118_v58   ;;  %1276 = vperm.xlu0 %2221, %v2125_v34  }
 0x1fd   : > { %v3332_v8 = vpop.permute.xlu1 %1271  ;;  %v3334_v15 = vpop.permute.xlu0 %1654 }
 0x200   : > { %1427 = vperm.xlu1 %2222, %v2134_v11   ;;  %1340 = vrot.lane.b32.xlu0 %v607_v48, %s2308_s20  ;;  %v841_v11 = vsel %vm723_vm3, %v2985_v37, %v3042_v50 }
 0x201   : > { %v3340_v16 = vpop.permute.xlu1 %1659  ;;  %v1131_v47 = vpop.permute.xlu0 %1130 }
 0x202   : > { %v1150_v58 = vmul.f32 %v1131_v47, %v3120_v51  ;;  %v1151_v48 = vmul.f32 %v1131_v47, %v3136_v39  ;;  %v849_v47 = vsel %vm723_vm3, %v3042_v50, %v2985_v37  ;;  %v912_v37 = vmul.f32 %v2695_v43, %v841_v11 }
 0x204   : > { %1540 = vperm.xlu1 %2222, %v2142_v41   ;;  %1356 = vrot.lane.b32.xlu0 %v608_v60, %s2308_s20  ;;  %v836_v41 = vsel %vm723_vm3, %v2987_v40, %v3062_v46 }
 0x205   : > { %v3346_v22 = vpop.permute.xlu1 %1135  ;;  %v1196_v13 = vpop.permute.xlu0 %1195 }
 0x206   : > { %v1215_v34 = vmul.f32 %v1196_v13, %v2785_v17  ;;  %v1216_v21 = vmul.f32 %v1196_v13, %v2811_v27  ;;  %v911_v13 = vmul.f32 %v2695_v43, %v849_v47 }
 0x208   : > { %v3355_v9 = vadd.f32 %v1215_v34, %v1150_v58  ;;  %v3357_v23 = vadd.f32 %v1216_v21, %v1151_v48  ;;  %1281 = vperm.xlu1 %2222, %v2126_v57   ;;  %1454 = vrot.lane.b32.xlu0 %v2907_v3, %s2308_s20  ;;  %v844_v3 = vsel %vm723_vm3, %v3062_v46, %v2987_v40  ;;  %v2149_v40 = vld [vmem:[%s4050_s3 + $0x230] sm:$0xff] }
 0x209   : > { %v702_v60 = vpop.permute.xlu1 %701  ;;  %v692_v5 = vpop.permute.xlu0 %691  ;;  %v901_v50 = vmul.f32 %v2685_v38, %v844_v3  ;;  %v902_v57 = vmul.f32 %v2685_v38, %v836_v41  ;;  %v1148_v41 = vmul.f32 %v2943_v25, %v3014_v36 }
 0x20c   : > { %1342 = vrot.lane.b32.xlu1 %v3014_v36, %s2308_s20  ;;  %1470 = vrot.lane.b32.xlu0 %v2933_v42, %s2308_s20  ;;  %v2085_v36 = vld [vmem:[%s4052_s5 + $0x4] sm:$0x3] }
 0x20d   : > { %v718_v58 = vpop.permute.xlu1 %717  ;;  %v708_v48 = vpop.permute.xlu0 %707 }
 0x20e   : > { %v729_v46 = vsel %vm723_vm3, %v702_v60, %v718_v58  ;;  %v737_v42 = vsel %vm723_vm3, %v718_v58, %v702_v60  ;;  %v724_v34 = vsel %vm723_vm3, %v692_v5, %v708_v48  ;;  %v732_v43 = vsel %vm723_vm3, %v708_v48, %v692_v5 }
 0x20f   : > { %v798_v38 = vmul.f32 %v2679_v35, %v737_v42  ;;  %v799_v21 = vmul.f32 %v2679_v35, %v729_v46  ;;  %v788_v11 = vmul.f32 %v2669_v30, %v732_v43  ;;  %v789_v47 = vmul.f32 %v2669_v30, %v724_v34 }
 0x210   : > { %v1149_v60 = vmul.f32 %v2943_v25, %v3036_v61  ;;  %1358 = vrot.lane.b32.xlu1 %v3036_v61, %s2308_s20  ;;  %1664 = vperm.xlu0 %2221, %v2149_v40   ;;  %v1213_v30 = vmul.f32 %v2961_v55, %v2710_v52  ;;  %v1214_v42 = vmul.f32 %v2961_v55, %v2738_v4 }
 0x211   : > { %v927_v5 = vadd.f32 %v911_v13, %v798_v38  ;;  %v928_v3 = vadd.f32 %v912_v37, %v799_v21  ;;  %v917_v58 = vadd.f32 %v901_v50, %v788_v11  ;;  %v918_v35 = vadd.f32 %v902_v57, %v789_v47  ;;  %v944_v48 = vpop.permute.xlu1 %943  ;;  %v934_v46 = vpop.permute.xlu0 %933  ;;  %v4174_v38 = vld [vmem:[#allocation23_spill] sm:$0xff]  ;;  %v4175_v47 = vld [vmem:[#allocation18_spill] sm:$0xff] }
 0x212   : > { %v1478_v25 = vsel %vm1364_vm4, %v3006_v54, %v3078_v20  ;;  %v1229_v61 = vadd.f32 %v1213_v30, %v1148_v41  ;;  %v1230_v13 = vadd.f32 %v1214_v42, %v1149_v60  ;;  %v1294_v55 = vmul.f32 %v3332_v8, %v3059_v18 }
 0x213   : > { %v1295_v37 = vmul.f32 %v3332_v8, %v3075_v12  ;;  %v3427_v50 = vrot.slane %v2085_v36, %v2989_v45  ;;  %v3430_v57 = vrot.slane %v2085_v36, %v3004_v24  ;;  %v1486_v30 = vsel %vm1364_vm4, %v3078_v20, %v3006_v54 }
 0x214   : > { %1456 = vrot.lane.b32.xlu1 %v2710_v52, %s2308_s20  ;;  %1583 = vrot.lane.b32.xlu0 %v3283_v0, %s2308_s20 }
 0x215   : > { %v960_v40 = vpop.permute.xlu1 %959  ;;  %v950_v34 = vpop.permute.xlu0 %949 }
 0x216   : > { %v970_v52 = vsel %vm723_vm3, %v944_v48, %v960_v40  ;;  %v978_v0 = vsel %vm723_vm3, %v960_v40, %v944_v48  ;;  %v965_v43 = vsel %vm723_vm3, %v934_v46, %v950_v34  ;;  %v973_v8 = vsel %vm723_vm3, %v950_v34, %v934_v46  ;;  %v4176_v48 = vld [vmem:[#allocation47_spill] sm:$0xff] }
 0x217   : > { %v1040_v21 = vmul.f32 %v4174_v38, %v978_v0  ;;  %v1041_v11 = vmul.f32 %v4174_v38, %v970_v52  ;;  %v1030_v41 = vmul.f32 %v4175_v47, %v973_v8  ;;  %v1031_v60 = vmul.f32 %v4175_v47, %v965_v43  ;;  %v2150_v0 = vld [vmem:[%s4050_s3 + $0x238] sm:$0xff]  ;;  %v4177_v43 = vld [vmem:[#allocation28_spill] sm:$0xff] }
 0x218   : > { %v837_v42 = vsel %vm723_vm3, %v4176_v48, %v3116_v1  ;;  %v845_v46 = vsel %vm723_vm3, %v3116_v1, %v4176_v48  ;;  %1472 = vrot.lane.b32.xlu1 %v2738_v4, %s2308_s20  ;;  %1599 = vrot.lane.b32.xlu0 %v3293_v33, %s2308_s20  ;;  %v1543_v8 = vmul.f32 %v4177_v43, %v1478_v25  ;;  %v4179_v25 = vld [vmem:[#allocation46_spill] sm:$0xff] }
 0x219   : > { %v1056_v36 = vadd.f32 %v1040_v21, %v927_v5  ;;  %v1057_v40 = vadd.f32 %v1041_v11, %v928_v3  ;;  %v1046_v34 = vadd.f32 %v1030_v41, %v917_v58  ;;  %v1047_v54 = vadd.f32 %v1031_v60, %v918_v35  ;;  %v694_v20 = vpop.permute.xlu1 %693  ;;  %v1333_v52 = vpop.permute.xlu0 %1332  ;;  %v4178_v58 = vld [vmem:[#allocation12_spill] sm:$0xff] }
 0x21a   : > { %v1310_v38 = vadd.f32 %v1294_v55, %v1229_v61  ;;  %v1311_v1 = vadd.f32 %v1295_v37, %v1230_v13  ;;  %v1544_v3 = vmul.f32 %v4177_v43, %v1486_v30  ;;  %v903_v35 = vmul.f32 %v4178_v58, %v845_v46  ;;  %v4180_v13 = vld [vmem:[#allocation45_spill] sm:$0xff]  ;;  %v4181_v46 = vld [vmem:[#allocation6_spill] sm:$0xff] }
 0x21b   : > { %v1083_v47 = vmul.f32 %v3427_v50, %v1056_v36  ;;  %v1084_v4 = vmul.f32 %v3430_v57, %v1057_v40  ;;  %v1073_v33 = vmul.f32 %v3427_v50, %v1046_v34  ;;  %v1074_v5 = vmul.f32 %v3430_v57, %v1047_v54  ;;  %v4182_v34 = vld [vmem:[#allocation26_spill] sm:$0xff] }
 0x21c   : > { %v904_v21 = vmul.f32 %v4178_v58, %v837_v42  ;;  %1669 = vperm.xlu1 %2222, %v2150_v0   ;;  %1344 = vrot.lane.b32.xlu0 %v3120_v51, %s2308_s20 }
 0x21d   : > { %v1316_v61 = vadd.f32 %v4179_v25, %v1073_v33  ;;  %v1317_v55 = vadd.f32 %v4180_v13, %v1074_v5  ;;  %v710_v37 = vpop.permute.xlu1 %709  ;;  %v1349_v11 = vpop.permute.xlu0 %1348  ;;  %v3475_v41 = vadd.f32 %v1310_v38, %v1083_v47  ;;  %v3477_v60 = vadd.f32 %v1311_v1, %v1084_v4  ;;  %v2086_v4 = vld [vmem:[%s4052_s5 + $0x6] sm:$0x3] }
 0x21e   : > { %v725_v30 = vsel %vm723_vm3, %v694_v20, %v710_v37  ;;  %v733_v48 = vsel %vm723_vm3, %v710_v37, %v694_v20  ;;  %v1365_v42 = vsel %vm1364_vm4, %v1333_v52, %v1349_v11  ;;  %v1373_v51 = vsel %vm1364_vm4, %v1349_v11, %v1333_v52  ;;  %v4185_v13 = vld [vmem:[#allocation30_spill] sm:$0xff] }
 0x21f   : > { %v790_v36 = vmul.f32 %v4181_v46, %v733_v48  ;;  %v791_v40 = vmul.f32 %v4181_v46, %v725_v30  ;;  %v1430_v54 = vmul.f32 %v4182_v34, %v1365_v42  ;;  %v1431_v0 = vmul.f32 %v4182_v34, %v1373_v51  ;;  %v4186_v30 = vld [vmem:[#allocation49_spill] sm:$0xff] }
 0x220   : > { %1585 = vrot.lane.b32.xlu1 %v3059_v18, %s2308_s20  ;;  %1360 = vrot.lane.b32.xlu0 %v3136_v39, %s2308_s20  ;;  %v4183_v18 = vld [vmem:[#allocation48_spill] sm:$0xff]  ;;  %v3510_v5 = vrot.slane %v2086_v4, %v3004_v24  ;;  %v842_v48 = vsel %vm723_vm3, %v4186_v30, %v3133_v26  ;;  %v850_v42 = vsel %vm723_vm3, %v3133_v26, %v4186_v30 }
 0x221   : > { %v919_v20 = vadd.f32 %v903_v35, %v790_v36  ;;  %v920_v43 = vadd.f32 %v904_v21, %v791_v40  ;;  %v1559_v38 = vadd.f32 %v1543_v8, %v1430_v54  ;;  %v1560_v1 = vadd.f32 %v1544_v3, %v1431_v0  ;;  %v936_v47 = vpop.permute.xlu1 %935  ;;  %v1576_v52 = vpop.permute.xlu0 %1575  ;;  %v4184_v21 = vld [vmem:[#allocation19_spill] sm:$0xff]  ;;  %v1751_v54 = vld [vmem:[%s4051_s4 + $0x20] sm:$0xff]  ;;  %v4187_v0 = vld [vmem:[#allocation29_spill] sm:$0xff] }
 0x222   : > { %v1479_v39 = vsel %vm1364_vm4, %v4183_v18, %v3129_v49  ;;  %v3507_v8 = vrot.slane %v2086_v4, %v2989_v45  ;;  %v1487_v11 = vsel %vm1364_vm4, %v3129_v49, %v4183_v18  ;;  %v4189_v18 = vld [vmem:[#allocation51_spill] sm:$0xff] }
 0x224   : > { %1601 = vrot.lane.b32.xlu1 %v3075_v12, %s2308_s20  ;;  %1458 = vrot.lane.b32.xlu0 %v2785_v17, %s2308_s20 }
 0x225   : > { %v952_v33 = vpop.permute.xlu1 %951  ;;  %v1592_v3 = vpop.permute.xlu0 %1591 }
 0x226   : > { %v966_v58 = vsel %vm723_vm3, %v936_v47, %v952_v33  ;;  %v974_v12 = vsel %vm723_vm3, %v952_v33, %v936_v47  ;;  %v1607_v17 = vsel %vm1364_vm4, %v1576_v52, %v1592_v3  ;;  %v1615_v35 = vsel %vm1364_vm4, %v1592_v3, %v1576_v52  ;;  %v4190_v33 = vld [vmem:[#allocation50_spill] sm:$0xff] }
 0x227   : > { %v1032_v25 = vmul.f32 %v4184_v21, %v974_v12  ;;  %v1033_v45 = vmul.f32 %v4184_v21, %v966_v58  ;;  %v1672_v24 = vmul.f32 %v4185_v13, %v1607_v17  ;;  %v1673_v37 = vmul.f32 %v4185_v13, %v1615_v35 }
 0x228   : > { %1346 = vrot.lane.b32.xlu1 %v3172_v31, %s2308_s20  ;;  %1474 = vrot.lane.b32.xlu0 %v2811_v27, %s2308_s20  ;;  %v1545_v47 = vmul.f32 %v4187_v0, %v1479_v39 }
 0x229   : > { %v1048_v51 = vadd.f32 %v1032_v25, %v919_v20  ;;  %v1049_v46 = vadd.f32 %v1033_v45, %v920_v43  ;;  %v1688_v36 = vadd.f32 %v1672_v24, %v1559_v38  ;;  %v1689_v49 = vadd.f32 %v1673_v37, %v1560_v1  ;;  %v1335_v40 = vpop.permute.xlu1 %1334  ;;  %v704_v34 = vpop.permute.xlu0 %703  ;;  %v4188_v43 = vld [vmem:[#allocation16_spill] sm:$0xff]  ;;  %v4191_v24 = vld [vmem:[#allocation27_spill] sm:$0xff] }
 0x22a   : > { %v1546_v20 = vmul.f32 %v4187_v0, %v1487_v11  ;;  %v913_v38 = vmul.f32 %v4188_v43, %v850_v42  ;;  %v914_v1 = vmul.f32 %v4188_v43, %v842_v48  ;;  %v4193_v48 = vld [vmem:[#allocation32_spill] sm:$0xff]  ;;  %v4196_v0 = vld [vmem:[#allocation53_spill] sm:$0xff] }
 0x22b   : > { %v1075_v26 = vmul.f32 %v3427_v50, %v1048_v51  ;;  %v1076_v52 = vmul.f32 %v3430_v57, %v1049_v46  ;;  %v1715_v4 = vmul.f32 %v3507_v8, %v1688_v36  ;;  %v1716_v27 = vmul.f32 %v3510_v5, %v1689_v49  ;;  %v4194_v42 = vld [vmem:[#allocation52_spill] sm:$0xff] }
 0x22c   : > { %1362 = vrot.lane.b32.xlu1 %v3192_v53, %s2308_s20  ;;  %1777 = vperm.xlu0 %2221, %v1751_v54   ;;  %v4195_v54 = vld [vmem:[#allocation34_spill] sm:$0xff] }
 0x22d   : > { %v1318_v39 = vadd.f32 %v4189_v18, %v1075_v26  ;;  %v1319_v3 = vadd.f32 %v4190_v33, %v1076_v52  ;;  %v3555_v58 = vadd.f32 %v1715_v4, %v1316_v61  ;;  %v3557_v12 = vadd.f32 %v1716_v27, %v1317_v55  ;;  %v1351_v17 = vpop.permute.xlu1 %1350  ;;  %v720_v35 = vpop.permute.xlu0 %719  ;;  %v4192_v55 = vld [vmem:[#allocation10_spill] sm:$0xff]  ;;  %v1752_v4 = vld [vmem:[%s4051_s4 + $0x28] sm:$0xff] }
 0x22e   : > { %v1366_v21 = vsel %vm1364_vm4, %v1335_v40, %v1351_v17  ;;  %v1374_v25 = vsel %vm1364_vm4, %v1351_v17, %v1335_v40  ;;  %v730_v45 = vsel %vm723_vm3, %v704_v34, %v720_v35  ;;  %v738_v13 = vsel %vm723_vm3, %v720_v35, %v704_v34  ;;  %v4198_v17 = vld [vmem:[#allocation24_spill] sm:$0xff] }
 0x22f   : > { %v1432_v37 = vmul.f32 %v4191_v24, %v1366_v21  ;;  %v1433_v61 = vmul.f32 %v4191_v24, %v1374_v25  ;;  %v800_v11 = vmul.f32 %v4192_v55, %v738_v13  ;;  %v801_v30 = vmul.f32 %v4192_v55, %v730_v45  ;;  %v4199_v25 = vld [vmem:[#allocation57_spill] sm:$0xff]  ;;  %v4200_v45 = vld [vmem:[#allocation54_spill] sm:$0xff] }
 0x230   : > { %1460 = vrot.lane.b32.xlu1 %v4193_v48, %s2308_s20  ;;  %1587 = vrot.lane.b32.xlu0 %v4194_v42, %s2308_s20  ;;  %v843_v13 = vsel %vm723_vm3, %v4200_v45, %v4199_v25  ;;  %v851_v24 = vsel %vm723_vm3, %v4199_v25, %v4200_v45  ;;  %v4204_v25 = vld [vmem:[#allocation11_spill] sm:$0xff] }
 0x231   : > { %v1561_v51 = vadd.f32 %v1545_v47, %v1432_v37  ;;  %v1562_v46 = vadd.f32 %v1546_v20, %v1433_v61  ;;  %v929_v36 = vadd.f32 %v913_v38, %v800_v11  ;;  %v930_v49 = vadd.f32 %v914_v1, %v801_v30  ;;  %v1578_v40 = vpop.permute.xlu1 %1577  ;;  %v946_v34 = vpop.permute.xlu0 %945  ;;  %v1753_v47 = vld [vmem:[%s4051_s4 + $0x30] sm:$0xff]  ;;  %v4197_v1 = vld [vmem:[#allocation31_spill] sm:$0xff] }
 0x234   : > { %1476 = vrot.lane.b32.xlu1 %v4195_v54, %s2308_s20  ;;  %1603 = vrot.lane.b32.xlu0 %v4196_v0, %s2308_s20 }
 0x235   : > { %v1594_v26 = vpop.permute.xlu1 %1593  ;;  %v962_v52 = vpop.permute.xlu0 %961 }
 0x236   : > { %v1608_v27 = vsel %vm1364_vm4, %v1578_v40, %v1594_v26  ;;  %v1616_v20 = vsel %vm1364_vm4, %v1594_v26, %v1578_v40  ;;  %v971_v43 = vsel %vm723_vm3, %v946_v34, %v962_v52  ;;  %v979_v38 = vsel %vm723_vm3, %v962_v52, %v946_v34  ;;  %v1885_v34 = vld [vmem:[%s4054_s7] sm:$0xff]  ;;  %v4201_v26 = vld [vmem:[#allocation55_spill] sm:$0xff] }
 0x237   : > { %v1674_v18 = vmul.f32 %v4197_v1, %v1608_v27  ;;  %v1675_v33 = vmul.f32 %v4197_v1, %v1616_v20  ;;  %v1042_v35 = vmul.f32 %v4198_v17, %v979_v38  ;;  %v1043_v21 = vmul.f32 %v4198_v17, %v971_v43  ;;  %v4203_v27 = vld [vmem:[#allocation13_spill] sm:$0xff] }
 0x238   : > { %1782 = vperm.xlu1 %2222, %v1752_v4   ;;  %1787 = vperm.xlu0 %2221, %v1753_v47   ;;  %v838_v52 = vsel %vm723_vm3, %v4201_v26, %v3203_v29 }
 0x239   : > { %v1690_v37 = vadd.f32 %v1674_v18, %v1561_v51  ;;  %v1691_v61 = vadd.f32 %v1675_v33, %v1562_v46  ;;  %v3605_v55 = vadd.f32 %v1042_v35, %v929_v36  ;;  %v3607_v11 = vadd.f32 %v1043_v21, %v930_v49  ;;  %v706_v30 = vpop.permute.xlu1 %705  ;;  %v696_v40 = vpop.permute.xlu0 %695  ;;  %v4202_v49 = vld [vmem:[#allocation17_spill] sm:$0xff] }
 0x23a   : > { %v846_v51 = vsel %vm723_vm3, %v3203_v29, %v4201_v26  ;;  %v915_v4 = vmul.f32 %v4202_v49, %v851_v24  ;;  %v916_v47 = vmul.f32 %v4202_v49, %v843_v13  ;;  %v906_v43 = vmul.f32 %v4203_v27, %v838_v52  ;;  %v1886_v49 = vld [vmem:[%s4054_s7 + $0x8] sm:$0xff] }
 0x23b   : > { %v1717_v46 = vmul.f32 %v3507_v8, %v1690_v37  ;;  %v1718_v36 = vmul.f32 %v3510_v5, %v1691_v61  ;;  %v905_v20 = vmul.f32 %v4203_v27, %v846_v51  ;;  %v4206_v37 = vld [vmem:[#allocation61_spill] sm:$0xff] }
 0x23c   : > { %1589 = vrot.lane.b32.xlu1 %v3208_v10, %s2308_s20  ;;  %1889 = vperm.xlu0 %2221, %v1885_v34  }
 0x23d   : > { %v3628_v38 = vadd.f32 %v1717_v46, %v1318_v39  ;;  %v3630_v1 = vadd.f32 %v1718_v36, %v1319_v3  ;;  %v722_v29 = vpop.permute.xlu1 %721  ;;  %v712_v18 = vpop.permute.xlu0 %711  ;;  %v4205_v3 = vld [vmem:[#allocation7_spill] sm:$0xff] }
 0x23e   : > { %v731_v33 = vsel %vm723_vm3, %v706_v30, %v722_v29  ;;  %v739_v17 = vsel %vm723_vm3, %v722_v29, %v706_v30  ;;  %v726_v35 = vsel %vm723_vm3, %v696_v40, %v712_v18  ;;  %v734_v21 = vsel %vm723_vm3, %v712_v18, %v696_v40  ;;  %v1754_v40 = vld [vmem:[%s4051_s4 + $0x38] sm:$0xff] }
 0x23f   : > { %v802_v45 = vmul.f32 %v4204_v25, %v739_v17  ;;  %v803_v39 = vmul.f32 %v4204_v25, %v731_v33  ;;  %v792_v13 = vmul.f32 %v4205_v3, %v734_v21  ;;  %v793_v24 = vmul.f32 %v4205_v3, %v726_v35  ;;  %v4208_v33 = vld [vmem:[#allocation20_spill] sm:$0xff] }
 0x240   : > { %1605 = vrot.lane.b32.xlu1 %v4206_v37, %s2308_s20  ;;  %s2309_s20 = smov [#allocation3]  }
 0x241   : > { %v931_v61 = vadd.f32 %v915_v4, %v802_v45  ;;  %v932_v34 = vadd.f32 %v916_v47, %v803_v39  ;;  %v921_v30 = vadd.f32 %v905_v20, %v792_v13  ;;  %v922_v26 = vadd.f32 %v906_v43, %v793_v24  ;;  %v948_v52 = vpop.permute.xlu1 %947  ;;  %v938_v51 = vpop.permute.xlu0 %937  ;;  %v4207_v43 = vld [vmem:[#allocation25_spill] sm:$0xff]  ;;  %s2243_s25 = sshll.u32 %s2309_s20, 4  ;;  %s2244_s25 = int_to_ptr.vmem [resolvable:$false] %s2243_s25 }
 0x242   : > { %s2245_s26 = scalar_lea.vmem %s2244_s25, 1024  ;;  %p2246_p2 = scmp.lt.s32.totalorder %s3995_s18, %s2244_s25 }
 0x243   : > { %p2247_p3 = scmp.lt.s32.totalorder %s2245_s26, %s2239_s24 }
 0x244   : > { %1792 = vperm.xlu1 %2222, %v1754_v40  }
 0x245   : > { %v964_v46 = vpop.permute.xlu1 %963  ;;  %v954_v36 = vpop.permute.xlu0 %953  ;;  %p2248_p4 = por %p2247_p3, %p2246_p2 }
 0x246   : > { %v972_v27 = vsel %vm723_vm3, %v948_v52, %v964_v46  ;;  %v980_v4 = vsel %vm723_vm3, %v964_v46, %v948_v52  ;;  %v967_v47 = vsel %vm723_vm3, %v938_v51, %v954_v36  ;;  %v975_v20 = vsel %vm723_vm3, %v954_v36, %v938_v51  ;;  %v4209_v52 = vld [vmem:[#allocation60_spill] sm:$0xff]  ;;  %v4211_v46 = vld [vmem:[#allocation58_spill] sm:$0xff]  ;;  %v4212_v36 = vld [vmem:[#allocation59_spill] sm:$0xff] }
 0x247   : > { %v1044_v29 = vmul.f32 %v4207_v43, %v980_v4  ;;  %v1045_v18 = vmul.f32 %v4207_v43, %v972_v27  ;;  %v1034_v17 = vmul.f32 %v4208_v33, %v975_v20  ;;  %v1035_v35 = vmul.f32 %v4208_v33, %v967_v47  ;;  %v4210_v51 = vld [vmem:[#allocation56_spill] sm:$0xff]  ;;  %p2249_p5 = pnand %p2248_p4, %p2242_p1 }
 0x248   : > { %1894 = vperm.xlu1 %2222, %v1886_v49   ;;  %v1480_v40 = vsel %vm1364_vm4, %v4210_v51, %v4209_v52  ;;  %v4213_v47 = vld [vmem:[#allocation36_spill] sm:$0xff] }
 0x249   : > { %v3664_v21 = vadd.f32 %v1044_v29, %v931_v61  ;;  %v3666_v25 = vadd.f32 %v1045_v18, %v932_v34  ;;  %v1050_v45 = vadd.f32 %v1034_v17, %v921_v30  ;;  %v1051_v39 = vadd.f32 %v1035_v35, %v922_v26  ;;  %v1337_v3 = vpop.permute.xlu0 %1336  ;;  %v4214_v29 = vld [vmem:[#allocation33_spill] sm:$0xff]  ;;  %v4215_v17 = vld [vmem:[#allocation62_spill] sm:$0xff] }
 0x24a   : > { %v1488_v61 = vsel %vm1364_vm4, %v4209_v52, %v4210_v51  ;;  %v1547_v20 = vmul.f32 %v4213_v47, %v1480_v40  ;;  %v839_v35 = vsel %vm723_vm3, %v4215_v17, %v3285_v14  ;;  %v4216_v40 = vld [vmem:[#allocation14_spill] sm:$0xff] }
 0x24b   : > { %v1077_v13 = vmul.f32 %v3427_v50, %v1050_v45  ;;  %v1078_v24 = vmul.f32 %v3430_v57, %v1051_v39  ;;  %v1548_v43 = vmul.f32 %v4213_v47, %v1488_v61  ;;  %v847_v45 = vsel %vm723_vm3, %v3285_v14, %v4215_v17 }
 0x24c   : > { %v907_v61 = vmul.f32 %v4216_v40, %v847_v45 }
 0x24d   : > { %v1320_v34 = vadd.f32 %v4211_v46, %v1077_v13  ;;  %v1321_v30 = vadd.f32 %v4212_v36, %v1078_v24  ;;  %v1353_v26 = vpop.permute.xlu0 %1352  ;;  %v908_v46 = vmul.f32 %v4216_v40, %v839_v35  ;;  %v4217_v36 = vld [vmem:[#allocation8_spill] sm:$0xff] }
 0x24e   : > { %v1367_v49 = vsel %vm1364_vm4, %v1337_v3, %v1353_v26  ;;  %v1375_v27 = vsel %vm1364_vm4, %v1353_v26, %v1337_v3  ;;  %v698_v4 = vpop.permute.xlu1 %697 }
 0x24f   : > { %v1434_v18 = vmul.f32 %v4214_v29, %v1367_v49  ;;  %v1435_v33 = vmul.f32 %v4214_v29, %v1375_v27 }
 0x251   : > { %v1563_v39 = vadd.f32 %v1547_v20, %v1434_v18  ;;  %v1564_v3 = vadd.f32 %v1548_v43, %v1435_v33  ;;  %v1580_v13 = vpop.permute.xlu0 %1579  ;;  %v4218_v18 = vld [vmem:[#allocation38_spill] sm:$0xff] }
 0x252   : > { %v714_v24 = vpop.permute.xlu1 %713 }
 0x253   : > { %v727_v52 = vsel %vm723_vm3, %v698_v4, %v714_v24  ;;  %v735_v51 = vsel %vm723_vm3, %v714_v24, %v698_v4 }
 0x254   : > { %v794_v26 = vmul.f32 %v4217_v36, %v735_v51  ;;  %v795_v49 = vmul.f32 %v4217_v36, %v727_v52 }
 0x255   : > { %v1596_v27 = vpop.permute.xlu0 %1595 }
 0x256   : > { %v923_v14 = vadd.f32 %v907_v61, %v794_v26  ;;  %v924_v47 = vadd.f32 %v908_v46, %v795_v49  ;;  %v1609_v20 = vsel %vm1364_vm4, %v1580_v13, %v1596_v27  ;;  %v1617_v43 = vsel %vm1364_vm4, %v1596_v27, %v1580_v13  ;;  %v940_v29 = vpop.permute.xlu1 %939  ;;  %v4219_v13 = vld [vmem:[#allocation21_spill] sm:$0xff] }
 0x257   : > { %v1676_v4 = vmul.f32 %v4218_v18, %v1609_v20  ;;  %v1677_v33 = vmul.f32 %v4218_v18, %v1617_v43 }
 0x259   : > { %v1692_v17 = vadd.f32 %v1676_v4, %v1563_v39  ;;  %v1693_v35 = vadd.f32 %v1677_v33, %v1564_v3  ;;  %v700_v45 = vpop.permute.xlu0 %699 }
 0x25a   : > { %v956_v24 = vpop.permute.xlu1 %955 }
 0x25b   : > { %v1719_v52 = vmul.f32 %v3507_v8, %v1692_v17  ;;  %v1720_v51 = vmul.f32 %v3510_v5, %v1693_v35  ;;  %v968_v40 = vsel %vm723_vm3, %v940_v29, %v956_v24  ;;  %v976_v61 = vsel %vm723_vm3, %v956_v24, %v940_v29  ;;  %v4220_v29 = vld [vmem:[#allocation15_spill] sm:$0xff] }
 0x25c   : > { %v1036_v46 = vmul.f32 %v4219_v13, %v976_v61  ;;  %v1037_v36 = vmul.f32 %v4219_v13, %v968_v40  ;;  %v909_v4 = vmul.f32 %v4220_v29, %v3275_v2  ;;  %v910_v33 = vmul.f32 %v4220_v29, %v3271_v28  ;;  %v4222_v35 = vld [vmem:[#allocation63_spill] sm:$0xff] }
 0x25d   : > { %v3718_v26 = vadd.f32 %v1719_v52, %v1320_v34  ;;  %v3720_v39 = vadd.f32 %v1720_v51, %v1321_v30  ;;  %v716_v3 = vpop.permute.xlu0 %715  ;;  %v4221_v34 = vld [vmem:[#allocation9_spill] sm:$0xff]  ;;  %v1489_v2 = vsel %vm1364_vm4, %v3298_v62, %v4222_v35 }
 0x25e   : > { %v1052_v49 = vadd.f32 %v1036_v46, %v923_v14  ;;  %v1053_v27 = vadd.f32 %v1037_v36, %v924_v47  ;;  %v728_v20 = vsel %vm723_vm3, %v700_v45, %v716_v3  ;;  %v736_v43 = vsel %vm723_vm3, %v716_v3, %v700_v45  ;;  %v1339_v18 = vpop.permute.xlu1 %1338  ;;  %v4223_v36 = vld [vmem:[#allocation37_spill] sm:$0xff] }
 0x25f   : > { %v796_v17 = vmul.f32 %v4221_v34, %v736_v43  ;;  %v797_v30 = vmul.f32 %v4221_v34, %v728_v20  ;;  %v1481_v45 = vsel %vm1364_vm4, %v4222_v35, %v3298_v62  ;;  %v4225_v34 = vld [vmem:[#allocation22_spill] sm:$0xff] }
 0x260   : > { %v1079_v14 = vmul.f32 %v3427_v50, %v1052_v49  ;;  %v1080_v47 = vmul.f32 %v3430_v57, %v1053_v27  ;;  %v1549_v3 = vmul.f32 %v4223_v36, %v1481_v45  ;;  %v1550_v49 = vmul.f32 %v4223_v36, %v1489_v2  ;;  %v4224_v27 = vld [vmem:[#allocation35_spill] sm:$0xff] }
 0x261   : > { %v925_v24 = vadd.f32 %v909_v4, %v796_v17  ;;  %v926_v28 = vadd.f32 %v910_v33, %v797_v30  ;;  %v942_v52 = vpop.permute.xlu0 %941 }
 0x262   : > { %v1322_v51 = vadd.f32 %v3262_v59, %v1079_v14  ;;  %v1323_v40 = vadd.f32 %v3264_v7, %v1080_v47  ;;  %v1355_v61 = vpop.permute.xlu1 %1354 }
 0x263   : > { %v1368_v13 = vsel %vm1364_vm4, %v1339_v18, %v1355_v61  ;;  %v1376_v46 = vsel %vm1364_vm4, %v1355_v61, %v1339_v18 }
 0x264   : > { %v1436_v62 = vmul.f32 %v4224_v27, %v1368_v13  ;;  %v1437_v20 = vmul.f32 %v4224_v27, %v1376_v46  ;;  %v4226_v13 = vld [vmem:[#allocation39_spill] sm:$0xff] }
 0x265   : > { %v958_v43 = vpop.permute.xlu0 %957 }
 0x266   : > { %v1565_v29 = vadd.f32 %v1549_v3, %v1436_v62  ;;  %v1566_v59 = vadd.f32 %v1550_v49, %v1437_v20  ;;  %v969_v7 = vsel %vm723_vm3, %v942_v52, %v958_v43  ;;  %v977_v4 = vsel %vm723_vm3, %v958_v43, %v942_v52  ;;  %v1582_v33 = vpop.permute.xlu1 %1581 }
 0x267   : > { %v1038_v18 = vmul.f32 %v4225_v34, %v977_v4  ;;  %v1039_v17 = vmul.f32 %v4225_v34, %v969_v7  ;;  %v1085_v34 = vmul.f32 %v3427_v50, %v3605_v55 }
 0x269   : > { %v1054_v30 = vadd.f32 %v1038_v18, %v925_v24  ;;  %v1055_v14 = vadd.f32 %v1039_v17, %v926_v28  ;;  %v1086_v18 = vmul.f32 %v3430_v57, %v3607_v11 }
 0x26a   : > { %v1598_v47 = vpop.permute.xlu1 %1597 }
 0x26b   : > { %v1081_v35 = vmul.f32 %v3427_v50, %v1054_v30  ;;  %v1082_v45 = vmul.f32 %v3430_v57, %v1055_v14  ;;  %v1610_v2 = vsel %vm1364_vm4, %v1582_v33, %v1598_v47  ;;  %v1618_v61 = vsel %vm1364_vm4, %v1598_v47, %v1582_v33 }
 0x26c   : > { %v1678_v52 = vmul.f32 %v4226_v13, %v1610_v2  ;;  %v1679_v46 = vmul.f32 %v4226_v13, %v1618_v61 }
 0x26d   : > { %v3767_v36 = vadd.f32 %v3328_v63, %v1081_v35  ;;  %v3770_v24 = vadd.f32 %v3330_v19, %v1082_v45  ;;  %v1152_v63 = vmul.f32 %v3346_v22, %v3172_v31  ;;  %v1153_v19 = vmul.f32 %v3346_v22, %v3192_v53 }
 0x26e   : > { %v1694_v28 = vadd.f32 %v1678_v52, %v1565_v29  ;;  %v1695_v3 = vadd.f32 %v1679_v46, %v1566_v59 }
 0x270   : > { %v1721_v49 = vmul.f32 %v3507_v8, %v1694_v28  ;;  %v1722_v27 = vmul.f32 %v3510_v5, %v1695_v3 }
 0x272   : > { %v3774_v62 = vadd.f32 %v1721_v49, %v1322_v51  ;;  %v3776_v20 = vadd.f32 %v1722_v27, %v1323_v40 }
 0x273   : > { %v3778_v43 = vpop.permute.xlu0 %1422 }
 0x277   : > { %v3780_v7 = vpop.permute.xlu0 %1535 }
 0x27b   : > { %v1201_v29 = vpop.permute.xlu1 %1200  ;;  %v1277_v59 = vpop.permute.xlu0 %1276 }
 0x27c   : > { %v1217_v4 = vmul.f32 %v1201_v29, %v4193_v48  ;;  %v1218_v33 = vmul.f32 %v1201_v29, %v4195_v54  ;;  %v1296_v51 = vmul.f32 %v1277_v59, %v4194_v42  ;;  %v1297_v40 = vmul.f32 %v1277_v59, %v4196_v0  ;;  %v4228_v59 = vld [vmem:[#allocation44_spill] sm:$0xff] }
 0x27e   : > { %v1233_v31 = vadd.f32 %v1217_v4, %v1152_v63  ;;  %v1234_v17 = vadd.f32 %v1218_v33, %v1153_v19  ;;  %v1312_v53 = vadd.f32 %v1296_v51, %v3355_v9  ;;  %v1313_v22 = vadd.f32 %v1297_v40, %v3357_v23 }
 0x27f   : > { %v3796_v30 = vpop.permute.xlu1 %1427  ;;  %v1341_v48 = vpop.permute.xlu0 %1340  ;;  %v1087_v9 = vmul.f32 %v3427_v50, %v3664_v21  ;;  %v1088_v23 = vmul.f32 %v3430_v57, %v3666_v25 }
 0x280   : > { %v3798_v54 = vadd.f32 %v1312_v53, %v1085_v34  ;;  %v3800_v42 = vadd.f32 %v1313_v22, %v1086_v18 }
 0x283   : > { %v3802_v0 = vpop.permute.xlu1 %1540  ;;  %v1357_v14 = vpop.permute.xlu0 %1356 }
 0x284   : > { %v1369_v27 = vsel %vm1364_vm4, %v1341_v48, %v1357_v14  ;;  %v1377_v63 = vsel %vm1364_vm4, %v1357_v14, %v1341_v48 }
 0x285   : > { %v1438_v4 = vmul.f32 %v4228_v59, %v1369_v27  ;;  %v1439_v33 = vmul.f32 %v4228_v59, %v1377_v63 }
 0x287   : > { %v1282_v55 = vpop.permute.xlu1 %1281  ;;  %v1455_v47 = vpop.permute.xlu0 %1454 }
 0x288   : > { %v1298_v11 = vmul.f32 %v1282_v55, %v3208_v10  ;;  %v1299_v35 = vmul.f32 %v1282_v55, %v4206_v37  ;;  %v4227_v10 = vld [vmem:[#allocation40_spill] sm:$0xff] }
 0x289   : > { %v3818_v37 = vadd.f32 %v4227_v10, %v3557_v12  ;;  %v3826_v49 = vadd.f32 %v4227_v10, %v3555_v58 }
 0x28a   : > { %v1314_v45 = vadd.f32 %v1298_v11, %v1233_v31  ;;  %v1315_v2 = vadd.f32 %v1299_v35, %v1234_v17 }
 0x28b   : > { %v1343_v61 = vpop.permute.xlu1 %1342  ;;  %v1471_v13 = vpop.permute.xlu0 %1470  ;;  %v1812_v12 = vmul.f32 %v3818_v37, %v3818_v37  ;;  %v1811_v40 = vmul.f32 %v3826_v49, %v3826_v49 }
 0x28c   : > { %v3810_v52 = vadd.f32 %v1314_v45, %v1087_v9  ;;  %v3812_v46 = vadd.f32 %v1315_v2, %v1088_v23  ;;  %v1482_v50 = vsel %vm1364_vm4, %v1455_v47, %v1471_v13  ;;  %v1490_v57 = vsel %vm1364_vm4, %v1471_v13, %v1455_v47 }
 0x28d   : > { %v1551_v19 = vmul.f32 %v3306_v56, %v1482_v50  ;;  %v1552_v29 = vmul.f32 %v3306_v56, %v1490_v57  ;;  %v1820_v31 = vmul.f32 0.035677407, %v1812_v12  ;;  %v1819_v11 = vmul.f32 0.035677407, %v1811_v40 }
 0x28f   : > { %v1359_v28 = vpop.permute.xlu1 %1358  ;;  %v3814_v3 = vpop.permute.xlu0 %1664  ;;  %v1567_v17 = vadd.f32 %v1551_v19, %v1438_v4  ;;  %v1568_v53 = vadd.f32 %v1552_v29, %v1439_v33  ;;  %v1828_v23 = vadd.f32 0.7978846, %v1820_v31  ;;  %v1827_v63 = vadd.f32 0.7978846, %v1819_v11 }
 0x290   : > { %v1370_v12 = vsel %vm1364_vm4, %v1343_v61, %v1359_v28 }
 0x291   : > { %v1440_v4 = vmul.f32 %v3304_v6, %v1370_v12 }
 0x293   : > { %v1457_v21 = vpop.permute.xlu1 %1456  ;;  %v1584_v25 = vpop.permute.xlu0 %1583 }
 0x297   : > { %v1473_v51 = vpop.permute.xlu1 %1472  ;;  %v1600_v58 = vpop.permute.xlu0 %1599 }
 0x298   : > { %v1611_v34 = vsel %vm1364_vm4, %v1584_v25, %v1600_v58  ;;  %v1619_v18 = vsel %vm1364_vm4, %v1600_v58, %v1584_v25  ;;  %v1483_v45 = vsel %vm1364_vm4, %v1457_v21, %v1473_v51  ;;  %v1491_v2 = vsel %vm1364_vm4, %v1473_v51, %v1457_v21 }
 0x299   : > { %v1680_v56 = vmul.f32 %v3334_v15, %v1611_v34  ;;  %v1681_v22 = vmul.f32 %v3334_v15, %v1619_v18  ;;  %v4229_v15 = vld [vmem:[#allocation41_spill] sm:$0xff]  ;;  %v1378_v21 = vsel %vm1364_vm4, %v1359_v28, %v1343_v61  ;;  %v1554_v19 = vmul.f32 %v3318_v44, %v1491_v2  ;;  %v4230_v61 = vld [vmem:[#allocation42_spill] sm:$0xff] }
 0x29a   : > { %v3858_v13 = vadd.f32 %v4229_v15, %v3630_v1  ;;  %v3862_v10 = vadd.f32 %v4229_v15, %v3628_v38  ;;  %v1553_v1 = vmul.f32 %v3318_v44, %v1483_v45  ;;  %v3886_v28 = vadd.f32 %v4230_v61, %v3718_v26 }
 0x29b   : > { %v1696_v48 = vadd.f32 %v1680_v56, %v1567_v17  ;;  %v1697_v14 = vadd.f32 %v1681_v22, %v1568_v53  ;;  %v3846_v55 = vpop.permute.xlu1 %1669  ;;  %v3848_v47 = vpop.permute.xlu0 %1344  ;;  %v1441_v33 = vmul.f32 %v3304_v6, %v1378_v21  ;;  %v1835_v58 = vmul.f32 %v1827_v63, %v3826_v49 }
 0x29c   : > { %v1814_v29 = vmul.f32 %v3858_v13, %v3858_v13  ;;  %v1813_v59 = vmul.f32 %v3862_v10, %v3862_v10  ;;  %v3893_v40 = vadd.f32 %v4230_v61, %v3720_v39  ;;  %v1569_v26 = vadd.f32 %v1553_v1, %v1440_v4  ;;  %v4231_v4 = vld [vmem:[#allocation43_spill] sm:$0xff] }
 0x29d   : > { %v1723_v35 = vmul.f32 %v3507_v8, %v1696_v48  ;;  %v1724_v9 = vmul.f32 %v3510_v5, %v1697_v14  ;;  %v1570_v31 = vadd.f32 %v1554_v19, %v1441_v33  ;;  %v1815_v22 = vmul.f32 %v3886_v28, %v3886_v28 }
 0x29e   : > { %v1822_v53 = vmul.f32 0.035677407, %v1814_v29  ;;  %v1821_v56 = vmul.f32 0.035677407, %v1813_v59  ;;  %v3920_v33 = vadd.f32 %v4231_v4, %v3774_v62 }
 0x29f   : > { %v1586_v50 = vpop.permute.xlu1 %1585  ;;  %v3864_v57 = vpop.permute.xlu0 %1360  ;;  %v1739_v25 = vadd.f32 %v1723_v35, %v3767_v36  ;;  %v1740_v27 = vadd.f32 %v1724_v9, %v3770_v24  ;;  %v1836_v24 = vmul.f32 %v1828_v23, %v3818_v37  ;;  %v1816_v35 = vmul.f32 %v3893_v40, %v3893_v40 }
 0x2a0   : > { %v1371_v38 = vsel %vm1364_vm4, %v3848_v47, %v3864_v57  ;;  %v1830_v2 = vadd.f32 0.7978846, %v1822_v53  ;;  %v1829_v15 = vadd.f32 0.7978846, %v1821_v56 }
 0x2a1   : > { %v1442_v36 = vmul.f32 %v3778_v43, %v1371_v38  ;;  %2223 = vtanh.f32 %v1836_v24  ;;  %v1824_v19 = vmul.f32 0.035677407, %v1816_v35 }
 0x2a2   : > { %2225 = vtanh.f32 %v1835_v58 }
 0x2a3   : > { %v1602_v51 = vpop.permute.xlu1 %1601  ;;  %v1459_v44 = vpop.permute.xlu0 %1458 }
 0x2a4   : > { %v1612_v34 = vsel %vm1364_vm4, %v1586_v50, %v1602_v51  ;;  %v1620_v18 = vsel %vm1364_vm4, %v1602_v51, %v1586_v50  ;;  %v1823_v50 = vmul.f32 0.035677407, %v1815_v22 }
 0x2a5   : > { %v1682_v17 = vmul.f32 %v3340_v16, %v1612_v34  ;;  %v1683_v6 = vmul.f32 %v3340_v16, %v1620_v18  ;;  %v1832_v18 = vadd.f32 0.7978846, %v1824_v19 }
 0x2a7   : > { %v1698_v39 = vadd.f32 %v1682_v17, %v1569_v26  ;;  %v1699_v48 = vadd.f32 %v1683_v6, %v1570_v31  ;;  %v3903_v14 = vpop.permute.xlu1 %1346  ;;  %v1475_v11 = vpop.permute.xlu0 %1474  ;;  %v3930_v26 = vadd.f32 %v4231_v4, %v3776_v20 }
 0x2a8   : > { %v1484_v9 = vsel %vm1364_vm4, %v1459_v44, %v1475_v11  ;;  %v1492_v58 = vsel %vm1364_vm4, %v1475_v11, %v1459_v44  ;;  %v1817_v44 = vmul.f32 %v3920_v33, %v3920_v33 }
 0x2a9   : > { %v1555_v16 = vmul.f32 %v3780_v7, %v1484_v9  ;;  %v1725_v23 = vmul.f32 %v3507_v8, %v1698_v39  ;;  %v1726_v45 = vmul.f32 %v3510_v5, %v1699_v48  ;;  %v1556_v6 = vmul.f32 %v3780_v7, %v1492_v58 }
 0x2aa   : > { %v1840_v48 = vmul.f32 %v1832_v18, %v3893_v40  ;;  %v1818_v11 = vmul.f32 %v3930_v26, %v3930_v26 }
 0x2ab   : > { %v1571_v63 = vadd.f32 %v1555_v16, %v1442_v36  ;;  %v1363_v12 = vpop.permute.xlu1 %1362  ;;  %v1778_v21 = vpop.permute.xlu0 %1777  ;;  %v1741_v38 = vadd.f32 %v1725_v23, %v3475_v41  ;;  %v1742_v1 = vadd.f32 %v1726_v45, %v3477_v60  ;;  %v1838_v41 = vmul.f32 %v1830_v2, %v3858_v13 }
 0x2ac   : > { %v1372_v24 = vsel %vm1364_vm4, %v3903_v14, %v1363_v12  ;;  %v1803_v29 = vadd.f32 %v1778_v21, %v1739_v25  ;;  %v1804_v59 = vadd.f32 %v1778_v21, %v1740_v27  ;;  %v1837_v60 = vmul.f32 %v1829_v15, %v3862_v10  ;;  %v2224_v62 = vpop.eup %2223 }
 0x2ad   : > { %v1444_v61 = vmul.f32 %v3796_v30, %v1372_v24  ;;  %v1831_v27 = vadd.f32 0.7978846, %v1823_v50  ;;  %v2226_v17 = vpop.eup %2225  ;;  %2227 = vtanh.f32 %v1838_v41  ;;  %v1825_v45 = vmul.f32 0.035677407, %v1817_v44 }
 0x2ae   : > { %v1851_v36 = vmul.f32 %v1803_v29, %v3826_v49  ;;  %v1852_v51 = vmul.f32 %v1804_v59, %v3818_v37  ;;  %v1379_v37 = vsel %vm1364_vm4, %v3864_v57, %v3848_v47  ;;  %2229 = vtanh.f32 %v1837_v60 }
 0x2af   : > { %v1461_v34 = vpop.permute.xlu1 %1460  ;;  %v1588_v25 = vpop.permute.xlu0 %1587  ;;  %v1839_v39 = vmul.f32 %v1831_v27, %v3886_v28  ;;  %v1443_v47 = vmul.f32 %v3778_v43, %v1379_v37  ;;  %v1826_v24 = vmul.f32 0.035677407, %v1818_v11  ;;  %v1833_v41 = vadd.f32 0.7978846, %v1825_v45 }
 0x2b0   : > { %v1859_v31 = vmul.f32 0.5, %v1851_v36  ;;  %v1860_v49 = vmul.f32 0.5, %v1852_v51 }
 0x2b1   : > { %v1572_v2 = vadd.f32 %v1556_v6, %v1443_v47  ;;  %2231 = vtanh.f32 %v1839_v39  ;;  %v1841_v37 = vmul.f32 %v1833_v41, %v3920_v33 }
 0x2b2   : > { %v1867_v53 = vmul.f32 %v2226_v17, %v1859_v31  ;;  %v1868_v56 = vmul.f32 %v2224_v62, %v1860_v49  ;;  %2233 = vtanh.f32 %v1840_v48 }
 0x2b3   : > { %v1477_v22 = vpop.permute.xlu1 %1476  ;;  %v1604_v20 = vpop.permute.xlu0 %1603  ;;  %2235 = vtanh.f32 %v1841_v37 }
 0x2b4   : > { %v3944_v57 = vadd.f32 %v1867_v53, %v1859_v31  ;;  %v1485_v7 = vsel %vm1364_vm4, %v1461_v34, %v1477_v22  ;;  %v1613_v35 = vsel %vm1364_vm4, %v1588_v25, %v1604_v20  ;;  %v1621_v16 = vsel %vm1364_vm4, %v1604_v20, %v1588_v25 }
 0x2b5   : > { %v1557_v9 = vmul.f32 %v3802_v0, %v1485_v7  ;;  %v1684_v23 = vmul.f32 %v3814_v3, %v1613_v35  ;;  %v1685_v15 = vmul.f32 %v3814_v3, %v1621_v16  ;;  %v1876_v43 = vadd.f32 %v1868_v56, %v1860_v49 }
 0x2b6   : > { %v1493_v29 = vsel %vm1364_vm4, %v1477_v22, %v1461_v34  ;;  %v1380_v3 = vsel %vm1364_vm4, %v1363_v12, %v3903_v14 }
 0x2b7   : > { %v1573_v50 = vadd.f32 %v1557_v9, %v1444_v61  ;;  %v1700_v21 = vadd.f32 %v1684_v23, %v1571_v63  ;;  %v1783_v19 = vpop.permute.xlu1 %1782  ;;  %v1701_v59 = vadd.f32 %v1685_v15, %v1572_v2  ;;  %v1558_v58 = vmul.f32 %v3802_v0, %v1493_v29  ;;  %v2228_v25 = vpop.eup %2227 }
 0x2b8   : > { %v1805_v4 = vadd.f32 %v1783_v19, %v1741_v38  ;;  %v1806_v36 = vadd.f32 %v1783_v19, %v1742_v1  ;;  %v1834_v1 = vadd.f32 0.7978846, %v1826_v24  ;;  %v1788_v31 = vpop.permute.xlu0 %1787  ;;  %v2230_v49 = vpop.eup %2229  ;;  %v1445_v14 = vmul.f32 %v3796_v30, %v1380_v3 }
 0x2b9   : > { %v1727_v51 = vmul.f32 %v3507_v8, %v1700_v21  ;;  %v1728_v60 = vmul.f32 %v3510_v5, %v1701_v59 }
 0x2ba   : > { %v1853_v61 = vmul.f32 %v1805_v4, %v3862_v10  ;;  %v1854_v63 = vmul.f32 %v1806_v36, %v3858_v13  ;;  %v1574_v0 = vadd.f32 %v1558_v58, %v1445_v14  ;;  %v1842_v6 = vmul.f32 %v1834_v1, %v3930_v26 }
 0x2bb   : > { %v1743_v34 = vadd.f32 %v1727_v51, %v3798_v54  ;;  %v1590_v38 = vpop.permute.xlu1 %1589  ;;  %v1744_v62 = vadd.f32 %v1728_v60, %v3800_v42  ;;  %v2232_v22 = vpop.eup %2231 }
 0x2bc   : > { %v1861_v27 = vmul.f32 0.5, %v1853_v61  ;;  %v1862_v18 = vmul.f32 0.5, %v1854_v63  ;;  %v2234_v7 = vpop.eup %2233  ;;  %2237 = vtanh.f32 %v1842_v6  ;;  %v1890_v61 = vpop.permute.xlu0 %1889 }
 0x2bd   : > { %v1807_v10 = vadd.f32 %v1788_v31, %v1743_v34  ;;  %v1808_v17 = vadd.f32 %v1788_v31, %v1744_v62  ;;  %v2236_v29 = vpop.eup %2235 }
 0x2be   : > { %v1869_v12 = vmul.f32 %v2230_v49, %v1861_v27  ;;  %v1870_v13 = vmul.f32 %v2228_v25, %v1862_v18 }
 0x2bf   : > { %v1855_v54 = vmul.f32 %v1807_v10, %v3886_v28  ;;  %v1606_v44 = vpop.permute.xlu1 %1605  ;;  %v1856_v56 = vmul.f32 %v1808_v17, %v3893_v40 }
 0x2c0   : > { %v1877_v53 = vadd.f32 %v1869_v12, %v1861_v27  ;;  %v1614_v42 = vsel %vm1364_vm4, %v1590_v38, %v1606_v44  ;;  %v1622_v30 = vsel %vm1364_vm4, %v1606_v44, %v1590_v38  ;;  %v1878_v11 = vadd.f32 %v1870_v13, %v1862_v18 }
 0x2c1   : > { %v1863_v20 = vmul.f32 0.5, %v1855_v54  ;;  %v1686_v39 = vmul.f32 %v3846_v55, %v1614_v42  ;;  %v1687_v48 = vmul.f32 %v3846_v55, %v1622_v30  ;;  %v1864_v28 = vmul.f32 0.5, %v1856_v56 }
 0x2c2   : > { %v2166_v47 = vpack.c.bf16 %v1877_v53, %v3944_v57  ;;  %v2164_v16 = vpack.c.bf16 %v1878_v11, %v1876_v43 }
 0x2c3   : > { %v1871_v35 = vmul.f32 %v2232_v22, %v1863_v20  ;;  %v1702_v40 = vadd.f32 %v1686_v39, %v1573_v50  ;;  %v1703_v9 = vadd.f32 %v1687_v48, %v1574_v0  ;;  %v1872_v23 = vmul.f32 %v2234_v7, %v1864_v28  ;;  %v1793_v57 = vpop.permute.xlu1 %1792 }
 0x2c4   : > { %2165 = vmatprep.subr.bf16.mxu1 %v2164_v16 }
 0x2c5   : > { %v1879_v32 = vadd.f32 %v1871_v35, %v1863_v20  ;;  %v1729_v45 = vmul.f32 %v3507_v8, %v1702_v40  ;;  %v1730_v2 = vmul.f32 %v3510_v5, %v1703_v9  ;;  %2167 = vmatpush1.bf16.msra.mxu1 %v2166_v47  ;;  %v1880_v55 = vadd.f32 %v1872_v23, %v1864_v28 }
 0x2c6   : > { %v2238_v8 = vpop.eup %2237 }
 0x2c7   : > { %v1745_v15 = vadd.f32 %v1729_v45, %v3810_v52  ;;  %v1746_v21 = vadd.f32 %v1730_v2, %v3812_v46  ;;  %v1883_v46 = vld [vmem:[%s4053_s6] sm:$0xff]  ;;  %v1895_v38 = vpop.permute.xlu1 %1894 }
 0x2c9   : > { %v1809_v19 = vadd.f32 %v1793_v57, %v1745_v15  ;;  %v1810_v24 = vadd.f32 %v1793_v57, %v1746_v21 }
 0x2cb   : > { %v1857_v50 = vmul.f32 %v1809_v19, %v3920_v33  ;;  %v1858_v43 = vmul.f32 %v1810_v24, %v3930_v26  ;;  %v4232_v33 = vmov 0.0   ;;  %v1884_v26 = vld [vmem:[%s4053_s6 + $0x8] sm:$0xff] }
 0x2cd   : > { %v1865_v59 = vmul.f32 0.5, %v1857_v50  ;;  %v1866_v4 = vmul.f32 0.5, %v1858_v43 }
 0x2cf   : > { %v1873_v36 = vmul.f32 %v2236_v29, %v1865_v59  ;;  %v1874_v5 = vmul.f32 %v2238_v8, %v1866_v4 }
 0x2d1   : > { %v1881_v51 = vadd.f32 %v1873_v36, %v1865_v59  ;;  %v1882_v41 = vadd.f32 %v1874_v5, %v1866_v4 }
 0x2d3   : > { %v2168_v3 = vpack.c.bf16 %v1882_v41, %v1880_v55  ;;  %v2170_v52 = vpack.c.bf16 %v1881_v51, %v1879_v32 }
 0x2d5   : > { %2169 = vmatprep.subr.bf16.mxu1 %v2168_v3 }
 0x2d6   : > { %2171 = vmatpush1.bf16.msra.mxu1 %v2170_v52 }
 0x2d9   : > { %2151 = vmatmul.mubr.msk.f32.vlgmr.msra.gmra.mrb[6].mxu1 %vm1897_vm5, %v1883_v46 }
 0x2da   : > { %1974 = vmatprep.mubr.f32.mxu1 %v4232_v33 }
 0x2dd   : > { %2152 = vmatmul.mubr.msk.f32.gmra.mrb[8].mxu1 %vm1897_vm5, %v1884_v26 }
 0x3ac   : > { %v1970_v63 = vpop.f32.mrb[6].mxu1 }
 0x3ad   : > { %v1971_v60 = vadd.f32 %v1970_v63, %v1890_v61  ;;  %v1972_v58 = vpop.f32.mrb[7].mxu1 }
 0x3ae   : > { %v1973_v34 = vadd.f32 %v1972_v58, %v1890_v61 }
 0x3af   : > { %1981 = vst [vmem:[%s329_s17] sm:$0xff] %v1971_v60 }
 0x3b0   : > { %1982 = vst [vmem:[%s329_s17 + $0x8] sm:$0xff] %v1973_v34  ;;  %v1976_v1 = vpop.f32.mrb[8].mxu1 }
 0x3b1   : > { %v1977_v25 = vadd.f32 %v1976_v1, %v1895_v38  ;;  %v1978_v27 = vpop.f32.mrb[9].mxu1 }
 0x3b2   : > { %v1979_v18 = vadd.f32 %v1978_v27, %v1895_v38 }
 0x3b3   : > { %1983 = vst [vmem:[%s329_s17 + $0x10] sm:$0xff] %v1977_v25 }
 0x3b4   : > { %1984 = vst [vmem:[%s329_s17 + $0x18] sm:$0xff] %v1979_v18 }
 0x3b5   : > { %2252 = shalt.err (!%p2249_p5)
}
 0x3b6   : > { %s2253_s12 = scalar_lea.hbm %s4000_s13, 512  ;;  %s2257_s21 = scalar_lea.hbm %s4055_s8, 1024 }
 0x3b7   : > { %p2254_p7 = scmp.ne.s32.totalorder %s4000_s13, %s2253_s12  ;;  %p2258_p12 = scmp.lt.u32.totalorder %s4000_s13, %s4055_s8 }
 0x3b8   : > { %p2259_p13 = scmp.lt.u32.totalorder %s2257_s21, %s2253_s12  ;;  %p2261_p1 = scmp.lt.u32.totalorder %s2253_s12, %s4000_s13 }
 0x3b9   : > { %p2255_p10 = pnand %p2254_p7, %p2395_p6 }
 0x3ba   : > { %p2260_p0 = por %p2259_p13, %p2258_p12 }
 0x3bb   : > { %p2256_p11 = pneg %p2255_p10 }
 0x3bc   : > { %p2262_p2 = por %p2261_p1, %p2260_p0 }
 0x3be   : > { %p2263_p3 = pnand %p2262_p2, %p2256_p11 }
 0x3c0   : > { %2266 = shalt.err (!%p2263_p3)
}
 0x3c1   : > { %s2310_s24 = smov 256   ;;  %s2311_s20 = smov 512  }
 0x3c2   : > { %2174 = dma.vmem_to_hbm [thread:$0]  (%p2395_p6), %s3995_s18, 512, %s4000_s13, %s4004_s9, %s2310_s24, %s2311_s20, %s2307_s19  }
 0x3c3 PF: > { %s2014_s25 = sand.u32 1, %s2289_s27   ;;  %p2177_p4 = pnand %p2069_p9, %p2399_p8 }
 0x3c4   : > { %s2015_s26 = scalar_lea.sflag [#allocation4], %s2014_s25 }
 0x3c5   : > { %2284 = dma.done.wait (!%p2177_p4), %s2015_s26, 512  }
 0x3c6   : > { %2286 = vsyncadd (!%p2177_p4), %s2015_s26, 4294966784  ;;  %p18_p5 = scmp.ge.s32.totalorder %s2380_s11, 4   ;;  %s4233_s27 = smov %s2293_s28 }
 0x3c7   : > { %s4234_s28 = smov %s2297_s29  ;;  %s4235_s29 = smov %s2393_s14 }
 0x3c8   : > { %s4236_s30 = smov %s2380_s11  ;;  %20 = sbr.rel (!%p18_p5) target bundleno = 3 (0x3), region = 126 }
 0x3cf   :  { %2020 = vsyncpa [#allocation4], 1 }
 0x3d0   :  { %2022 = vsyncpa [#allocation4 + $0x1], 1 }

</bundles_post_ra>
